<compile_context>
chip_gen: v7x
topology: tpu7x:2x2x1
jax: 0.10.0
libtpu: 0.0.40
codegen_flags: <defaults>
</compile_context>

<pallas_src>
import functools

import numpy as np
import jax
import jax.numpy as jnp
from jax.experimental import pallas as pl
from jax.experimental.pallas import tpu as pltpu


def _window_attention_kernel(q_ref, k_ref, v_ref, bm_ref, o_ref, *, scale, nW_blk):
    """One grid step processes BW windows x all H heads.

    Block shapes:
      q/k/v/o : (BW, H, N, D)      -- head split was done by the wrapper / DMA
      bm      : (nW_blk, H, N, N)  -- pre-fused relative-position bias (+ shift mask), bf16
    """
    BW, H, N, D = q_ref.shape
    groups = BW // nW_blk   # how many times the bias/mask block tiles over BW windows
    BH = BW * H

    # Fold the softmax scale into q in the input dtype (matches PyTorch's `q * scale`).
    q = q_ref[...]
    q = (q * jnp.asarray(scale, q.dtype)).reshape(BH, N, D)   # leading-dim reshape: free
    k = k_ref[...].reshape(BH, N, D)
    v = v_ref[...].reshape(BH, N, D)

    # Single batched QK^T over all (window, head) pairs; f32 accumulation on the MXU.
    s = jnp.einsum("bnd,bmd->bnm", q, k, preferred_element_type=jnp.float32)

    # Fused relative-position bias (+ shifted-window mask); only leading-dim reshapes.
    bm = bm_ref[...].astype(jnp.float32)                       # (nW_blk, H, N, N)
    s = (s.reshape(groups, nW_blk, H, N, N) + bm[None]).reshape(BH, N, N)

    # Softmax over keys in f32 with an EXACT normalization (parity with the reference;
    # the approximate reciprocal previously exceeded the 2e-3 tolerance).
    # Note: a bf16 exp would roughly double EUP throughput on v6e/v7x at some accuracy
    # cost; kept in f32 here for numerical parity.
    m = jnp.max(s, axis=-1, keepdims=True)
    e = jnp.exp(s - m)
    p = e / jnp.sum(e, axis=-1, keepdims=True)
    # attn_drop: module default p = 0.0 -> identity.
    # TODO(synk): attention dropout (attn_drop > 0) is not implemented.

    # Single batched PV; p is cast to the matmul input dtype, accumulation is f32, and
    # the result is cast to the output dtype immediately (no long-lived f32 set).
    o = jnp.einsum("bnm,bmd->bnd", p.astype(v.dtype), v,
                   preferred_element_type=jnp.float32)
    o_ref[...] = o.reshape(BW, H, N, D).astype(o_ref.dtype)


def _vmem_limits():
    """Generation-aware (budget_for_BW_pick, vmem_limit_bytes)."""
    try:
        info = pltpu.get_tpu_info()
        cap = int(getattr(info, "vmem_capacity_bytes", 0))
    except Exception:
        cap = 0
    if cap >= 100 * 1024 * 1024:          # v5e / v6e: 128 MiB physical VMEM
        return 48 * 1024 * 1024, 64 * 1024 * 1024
    # v7x (64 MiB physical, 32 MiB default scoped) or unknown backend: be conservative.
    return 16 * 1024 * 1024, 32 * 1024 * 1024


def _pick_block_windows(B_, nW, N, H, D, qkv_itemsize, bm_itemsize, vmem_budget_bytes):
    """Largest number of windows per grid step BW that (a) divides B_, (b) is
    compatible with the mask period nW, (c) fits the VMEM budget with the f32
    score/softmax live set and PV accumulator included, and (d) leaves >= 2 grid
    steps when possible so both TensorCores get work on multi-TC parts (v7x)."""
    divisors = [d for d in range(1, B_ + 1) if B_ % d == 0]
    cand = [d for d in divisors if (d % nW == 0) or (nW % d == 0)]  # always contains 1

    def vmem_bytes(bw):
        tiles = 2 * 4 * bw * H * N * D * qkv_itemsize      # double-buffered q, k, v, o blocks
        fused = 2 * min(bw, nW) * H * N * N * bm_itemsize  # resident bias(+mask) block
        live = 3 * bw * H * N * N * 4                      # f32 scores / exp / softmax
        live += bw * H * N * D * 4                         # f32 PV accumulator
        return tiles + fused + live

    feasible = [d for d in cand if vmem_bytes(d) <= vmem_budget_bytes]
    if not feasible:
        return min(cand, key=vmem_bytes)                   # smallest footprint (BW == 1)
    bw = max(feasible)
    if B_ // bw < 2:                                       # keep >= 2 grid steps if possible
        smaller = [d for d in feasible if B_ // d >= 2]
        if smaller:
            bw = max(smaller)
    return bw


def window_attention(q, k, v, bias, mask, *, num_heads, scale):
    """q, k, v: (B_, N, C); bias: (H, N, N); mask: (nW, N, N) or None.

    Returns (B_, N, C), matching WindowAttention.forward.
    """
    B_, N, C = q.shape
    H = num_heads
    D = C // H
    assert C == H * D

    # Head split is layout plumbing: one fused XLA transpose per operand, so the kernel
    # never lane-slices the channel axis.
    qh = q.reshape(B_, N, H, D).transpose(0, 2, 1, 3)
    kh = k.reshape(B_, N, H, D).transpose(0, 2, 1, 3)
    vh = v.reshape(B_, N, H, D).transpose(0, 2, 1, 3)

    # Fuse bias and (optional) shift mask into one tensor indexed by (window mod nW),
    # stored bf16 (exactly represents the 0/-100 mask; bias error << tolerance).
    if mask is None:
        bm = bias[None].astype(jnp.bfloat16)                                    # (1, H, N, N)
        nW = 1
    else:
        nW = mask.shape[0]
        assert B_ % nW == 0, "num_windows must divide B_ (windows are the fast axis of B_)"
        bm = (bias[None, :, :, :] + mask[:, None, :, :]).astype(jnp.bfloat16)   # (nW, H, N, N)

    budget, vmem_limit = _vmem_limits()
    BW = _pick_block_windows(B_, nW, N, H, D, qh.dtype.itemsize, bm.dtype.itemsize, budget)
    nW_blk = min(BW, nW)
    n_bm_blocks = nW // nW_blk
    grid = (B_ // BW,)

    if n_bm_blocks == 1:
        bm_index = lambda b: (0, 0, 0, 0)
    else:
        bm_index = lambda b: (b % n_bm_blocks, 0, 0, 0)

    kernel = functools.partial(_window_attention_kernel, scale=scale, nW_blk=nW_blk)

    cost = pl.CostEstimate(
        flops=int(4 * B_ * H * N * N * D + 6 * B_ * H * N * N),
        transcendentals=int(B_ * H * N * N),
        bytes_accessed=int(4 * B_ * N * C * qh.dtype.itemsize + bm.size * bm.dtype.itemsize),
    )

    out = pl.pallas_call(
        kernel,
        out_shape=jax.ShapeDtypeStruct((B_, H, N, D), q.dtype),
        grid=grid,
        in_specs=[
            pl.BlockSpec((BW, H, N, D), lambda b: (b, 0, 0, 0)),
            pl.BlockSpec((BW, H, N, D), lambda b: (b, 0, 0, 0)),
            pl.BlockSpec((BW, H, N, D), lambda b: (b, 0, 0, 0)),
            pl.BlockSpec((nW_blk, H, N, N), bm_index),
        ],
        out_specs=pl.BlockSpec((BW, H, N, D), lambda b: (b, 0, 0, 0)),
        compiler_params=pltpu.CompilerParams(
            dimension_semantics=("parallel",),
            vmem_limit_bytes=vmem_limit,
        ),
        cost_estimate=cost,
    )(qh, kh, vh, bm)

    # Head merge back to (B_, N, C) is layout plumbing done by XLA outside the kernel.
    return out.transpose(0, 2, 1, 3).reshape(B_, N, C)


def make_relative_position_bias(key, window_size, num_heads):
    """Build relative_position_bias of shape (num_heads, N, N) like the PyTorch module."""
    Wh, Ww = window_size
    coords_h = np.arange(Wh)
    coords_w = np.arange(Ww)
    coords = np.stack(np.meshgrid(coords_h, coords_w, indexing="ij"))      # (2, Wh, Ww)
    coords_flatten = coords.reshape(2, -1)                                 # (2, N)
    rel = coords_flatten[:, :, None] - coords_flatten[:, None, :]          # (2, N, N)
    rel = rel.transpose(1, 2, 0).copy()                                    # (N, N, 2)
    rel[:, :, 0] += Wh - 1
    rel[:, :, 1] += Ww - 1
    rel[:, :, 0] *= 2 * Ww - 1
    relative_position_index = rel.sum(-1)                                  # (N, N)

    table_shape = ((2 * Wh - 1) * (2 * Ww - 1), num_heads)
    table = 0.02 * jax.random.truncated_normal(key, -2.0, 2.0, table_shape, jnp.float32)

    N = Wh * Ww
    bias = table[relative_position_index.reshape(-1)].reshape(N, N, num_heads)
    bias = jnp.transpose(bias, (2, 0, 1))                                  # (H, N, N)
    return bias


def reference_window_attention(q, k, v, bias, mask, *, num_heads, scale):
    """Pure-JAX reference mirroring the PyTorch forward, for correctness checking."""
    B_, N, C = q.shape
    H = num_heads
    D = C // H
    qh = q.reshape(B_, N, H, D).transpose(0, 2, 1, 3) * scale
    kh = k.reshape(B_, N, H, D).transpose(0, 2, 1, 3)
    vh = v.reshape(B_, N, H, D).transpose(0, 2, 1, 3)
    attn = jnp.einsum("bhnd,bhmd->bhnm", qh, kh)
    attn = attn + bias[None]
    if mask is not None:
        nW = mask.shape[0]
        attn = attn.reshape(B_ // nW, nW, H, N, N) + mask[None, :, None]
        attn = attn.reshape(B_, H, N, N)
    attn = jax.nn.softmax(attn, axis=-1)
    x = jnp.einsum("bhnm,bhmd->bhnd", attn, vh)
    return x.transpose(0, 2, 1, 3).reshape(B_, N, C)


if __name__ == "__main__":
    # Small shapes consistent with the module
    window_size = (4, 4)                      # Wh, Ww
    N = window_size[0] * window_size[1]       # 16 tokens per window
    dim = 32                                  # C
    num_heads = 4
    head_dim = dim // num_heads
    scale = head_dim ** (-0.5)
    B = 2                                     # batch
    nW = 4                                    # windows per image
    B_ = B * nW                               # 8

    key = jax.random.PRNGKey(0)
    k_tab, k_q, k_k, k_v = jax.random.split(key, 4)

    bias = make_relative_position_bias(k_tab, window_size, num_heads)      # (H, N, N)

    q = jax.random.normal(k_q, (B_, N, dim), jnp.float32)
    k = jax.random.normal(k_k, (B_, N, dim), jnp.float32)
    v = jax.random.normal(k_v, (B_, N, dim), jnp.float32)

    # 0 / -100 shifted-window style mask (block pattern), shape (nW, N, N)
    half = N // 2
    row = np.arange(N)
    same_half = (row[:, None] < half) == (row[None, :] < half)
    base = np.where(same_half, 0.0, -100.0).astype(np.float32)
    mask_np = np.stack([base if (w % 2 == 1) else np.zeros((N, N), np.float32)
                        for w in range(nW)])
    mask = jnp.asarray(mask_np)

    out = jax.block_until_ready(
        window_attention(q, k, v, bias, mask, num_heads=num_heads, scale=scale))
    ref = reference_window_attention(q, k, v, bias, mask, num_heads=num_heads, scale=scale)
    np.testing.assert_allclose(np.asarray(out), np.asarray(ref), atol=2e-3, rtol=2e-3)

    # mask=None path (specialized: bias-only fused tensor, no mask stream)
    out_nomask = jax.block_until_ready(
        window_attention(q, k, v, bias, None, num_heads=num_heads, scale=scale))
    ref_nomask = reference_window_attention(q, k, v, bias, None,
                                            num_heads=num_heads, scale=scale)
    np.testing.assert_allclose(np.asarray(out_nomask), np.asarray(ref_nomask),
                               atol=2e-3, rtol=2e-3)

    print("KERNEL_OK")
</pallas_src>

<mosaic_0001>
module attributes {stable_mosaic.version = 11 : i64} {
  func.func @_window_attention_kernel(%arg0: i32, %arg1: memref<4x4x16x8xf32, #tpu.memory_space<vmem>>, %arg2: memref<4x4x16x8xf32, #tpu.memory_space<vmem>>, %arg3: memref<4x4x16x8xf32, #tpu.memory_space<vmem>>, %arg4: memref<4x4x16x16xbf16, #tpu.memory_space<vmem>>, %arg5: memref<4x4x16x8xf32, #tpu.memory_space<vmem>>) attributes {dimension_semantics = [#tpu.dimension_semantics<parallel>], iteration_bounds = array<i64: 2>, scalar_prefetch = 0 : i64, scratch_operands = 0 : i64, tpu.core_type = #tpu.core_type<tc>, window_params = [{transform_indices = @transform_0, window_bounds = array<i64: 4, 4, 16, 8>}, {transform_indices = @transform_1, window_bounds = array<i64: 4, 4, 16, 8>}, {transform_indices = @transform_2, window_bounds = array<i64: 4, 4, 16, 8>}, {pipeline_mode = #tpu.pipeline_mode<synchronous>, transform_indices = @transform_3, window_bounds = array<i64: 4, 4, 16, 16>}, {transform_indices = @transform_4, window_bounds = array<i64: 4, 4, 16, 8>}]} {
    %c0 = arith.constant 0 : index
    %c0_0 = arith.constant 0 : index
    %c0_1 = arith.constant 0 : index
    %c0_2 = arith.constant 0 : index
    %0 = vector.load %arg1[%c0, %c0_0, %c0_1, %c0_2] : memref<4x4x16x8xf32, #tpu.memory_space<vmem>>, vector<4x4x16x8xf32>
    %cst = arith.constant 0.353553385 : f32
    %1 = vector.broadcast %cst : f32 to vector<4x4x16x8xf32>
    %2 = arith.mulf %0, %1 : vector<4x4x16x8xf32>
    %3 = vector.shape_cast %2 : vector<4x4x16x8xf32> to vector<16x16x8xf32>
    %c0_3 = arith.constant 0 : index
    %c0_4 = arith.constant 0 : index
    %c0_5 = arith.constant 0 : index
    %c0_6 = arith.constant 0 : index
    %4 = vector.load %arg2[%c0_3, %c0_4, %c0_5, %c0_6] : memref<4x4x16x8xf32, #tpu.memory_space<vmem>>, vector<4x4x16x8xf32>
    %5 = vector.shape_cast %4 : vector<4x4x16x8xf32> to vector<16x16x8xf32>
    %c0_7 = arith.constant 0 : index
    %c0_8 = arith.constant 0 : index
    %c0_9 = arith.constant 0 : index
    %c0_10 = arith.constant 0 : index
    %6 = vector.load %arg3[%c0_7, %c0_8, %c0_9, %c0_10] : memref<4x4x16x8xf32, #tpu.memory_space<vmem>>, vector<4x4x16x8xf32>
    %7 = vector.shape_cast %6 : vector<4x4x16x8xf32> to vector<16x16x8xf32>
    "tpu.trace_start"() <{level = 10 : i32, message = "bnd,bmd->bnm"}> : () -> ()
    %cst_11 = arith.constant dense<0.000000e+00> : vector<16x16x16xf32>
    %8 = tpu.matmul %3, %5, %cst_11 {dimension_numbers = #tpu.dot_dimension_numbers<[2], [2], [1], [1], [0, 0, 0, 1, 1, 1], [0], [0]>} : vector<16x16x8xf32>, vector<16x16x8xf32>, vector<16x16x16xf32> -> vector<16x16x16xf32>
    "tpu.trace_stop"() : () -> ()
    %c0_12 = arith.constant 0 : index
    %c0_13 = arith.constant 0 : index
    %c0_14 = arith.constant 0 : index
    %c0_15 = arith.constant 0 : index
    %9 = vector.load %arg4[%c0_12, %c0_13, %c0_14, %c0_15] : memref<4x4x16x16xbf16, #tpu.memory_space<vmem>>, vector<4x4x16x16xbf16>
    %10 = arith.extf %9 : vector<4x4x16x16xbf16> to vector<4x4x16x16xf32>
    %11 = vector.shape_cast %8 : vector<16x16x16xf32> to vector<1x4x4x16x16xf32>
    %12 = vector.shape_cast %10 : vector<4x4x16x16xf32> to vector<1x4x4x16x16xf32>
    %13 = arith.addf %11, %12 : vector<1x4x4x16x16xf32>
    %14 = vector.shape_cast %13 : vector<1x4x4x16x16xf32> to vector<16x16x16xf32>
    %cst_16 = arith.constant dense<0xFF800000> : vector<16x16xf32>
    %15 = vector.multi_reduction <maximumf>, %14, %cst_16 [2] : vector<16x16x16xf32> to vector<16x16xf32>
    %16 = vector.shape_cast %15 : vector<16x16xf32> to vector<16x16x1xf32>
    %17 = vector.broadcast %16 : vector<16x16x1xf32> to vector<16x16x16xf32>
    %18 = arith.subf %14, %17 : vector<16x16x16xf32>
    %19 = math.exp %18 : vector<16x16x16xf32>
    %cst_17 = arith.constant dense<0.000000e+00> : vector<16x16xf32>
    %20 = vector.multi_reduction <add>, %19, %cst_17 [2] : vector<16x16x16xf32> to vector<16x16xf32>
    %21 = vector.shape_cast %20 : vector<16x16xf32> to vector<16x16x1xf32>
    %22 = vector.broadcast %21 : vector<16x16x1xf32> to vector<16x16x16xf32>
    %23 = arith.divf %19, %22 : vector<16x16x16xf32>
    "tpu.trace_start"() <{level = 10 : i32, message = "bnm,bmd->bnd"}> : () -> ()
    %cst_18 = arith.constant dense<0.000000e+00> : vector<16x16x8xf32>
    %24 = tpu.matmul %23, %7, %cst_18 {dimension_numbers = #tpu.dot_dimension_numbers<[2], [1], [1], [2], [0, 0, 0, 1, 1, 2], [0], [0]>} : vector<16x16x16xf32>, vector<16x16x8xf32>, vector<16x16x8xf32> -> vector<16x16x8xf32>
    "tpu.trace_stop"() : () -> ()
    %25 = vector.shape_cast %24 : vector<16x16x8xf32> to vector<4x4x16x8xf32>
    %c0_19 = arith.constant 0 : index
    %c0_20 = arith.constant 0 : index
    %c0_21 = arith.constant 0 : index
    %c0_22 = arith.constant 0 : index
    %26 = vector.load %arg5[%c0_19, %c0_20, %c0_21, %c0_22] : memref<4x4x16x8xf32, #tpu.memory_space<vmem>>, vector<4x4x16x8xf32>
    tpu.vector_store %arg5[%c0_19, %c0_20, %c0_21, %c0_22], %25 {strides = array<i32>} : memref<4x4x16x8xf32, #tpu.memory_space<vmem>>, vector<4x4x16x8xf32>,
    return
  }
  func.func @transform_0(%arg0: i32) -> (i32, i32, i32, i32) {
    %c0_i32 = arith.constant 0 : i32
    %c0_i32_0 = arith.constant 0 : i32
    %c0_i32_1 = arith.constant 0 : i32
    %c0_i32_2 = arith.constant 0 : i32
    return %arg0, %c0_i32, %c0_i32_0, %c0_i32_1 : i32, i32, i32, i32
  }
  func.func @transform_1(%arg0: i32) -> (i32, i32, i32, i32) {
    %c0_i32 = arith.constant 0 : i32
    %c0_i32_0 = arith.constant 0 : i32
    %c0_i32_1 = arith.constant 0 : i32
    %c0_i32_2 = arith.constant 0 : i32
    return %arg0, %c0_i32, %c0_i32_0, %c0_i32_1 : i32, i32, i32, i32
  }
  func.func @transform_2(%arg0: i32) -> (i32, i32, i32, i32) {
    %c0_i32 = arith.constant 0 : i32
    %c0_i32_0 = arith.constant 0 : i32
    %c0_i32_1 = arith.constant 0 : i32
    %c0_i32_2 = arith.constant 0 : i32
    return %arg0, %c0_i32, %c0_i32_0, %c0_i32_1 : i32, i32, i32, i32
  }
  func.func @transform_3(%arg0: i32) -> (i32, i32, i32, i32) {
    %c0_i32 = arith.constant 0 : i32
    %c0_i32_0 = arith.constant 0 : i32
    %c0_i32_1 = arith.constant 0 : i32
    %c0_i32_2 = arith.constant 0 : i32
    %c0_i32_3 = arith.constant 0 : i32
    return %c0_i32, %c0_i32_0, %c0_i32_1, %c0_i32_2 : i32, i32, i32, i32
  }
  func.func @transform_4(%arg0: i32) -> (i32, i32, i32, i32) {
    %c0_i32 = arith.constant 0 : i32
    %c0_i32_0 = arith.constant 0 : i32
    %c0_i32_1 = arith.constant 0 : i32
    %c0_i32_2 = arith.constant 0 : i32
    return %arg0, %c0_i32, %c0_i32_0, %c0_i32_1 : i32, i32, i32, i32
  }
}

</mosaic_0001>

<bundles_post_ra>
// kernel: tpu_custom_call.1
= control target key start
LH: loop header
LB: loop body
LE: loop exit
PB: predicated region body
PF: predicated region fallthrough
CT: control target
= control target key end

     0   :  { %s4515_s15 = smov 0   ;;  %s5222_s0 = inlined_call_operand.vmem [shape: f32[8,4,16,8], index: 0, kind: input, shape index: {}]   ;;  %s5223_s1 = inlined_call_operand.vmem [shape: f32[8,4,16,8], index: 1, kind: input, shape index: {}]   ;;  %s5224_s2 = inlined_call_operand.vmem [shape: f32[8,4,16,8], index: 2, kind: input, shape index: {}]   ;;  %s5225_s3 = inlined_call_operand.vmem [shape: bf16[4,4,16,16], index: 3, kind: input, shape index: {}]   ;;  %s5226_s4 = inlined_call_operand.vmem [shape: f32[8,4,16,8], index: 4, kind: output, shape index: {}]  }
   0x1 LB: > { %s3636_s16 = sadd.s32 4294967295, %s4488_s15   ;;  %p3640_p0 = scmp.ge.s32.totalorder %s4488_s15, 1  ;;  %s4488_s15 = sphi %s4515_s15, %s14_s15  }
   0x2   : > { %p188_p1 = scmp.lt.s32.totalorder %s4488_s15, 3 }
   0x4   : > { %p189_p2 = pnand %p3640_p0, %p188_p1 }
   0x5   : > { %s3641_s17 = sshll.u32 (!%p189_p2), %s3636_s16, 2  ;;  %vm384_vm0 = vcmask (!%p189_p2), 64512   ;;  %v3819_v0 = vld [vmem:[%s5225_s3 + $0x8] sm:$0xff] (!%p189_p2)   ;;  %vm1873_vm2 = vcmask (!%p189_p2), 130048  }
   0x6   : > { %192 = sbr.rel (%p189_p2) target bundleno = 833 (0x341), region = 36  ;;  %p229_p3 = scmp.lt.s32.totalorder (!%p189_p2), %s3641_s17, 7  ;;  %vm4533_vm1 = vmpackc.low (!%p189_p2), %vm384_vm0, %vm384_vm0 }
   0xd   : > { %s5230_s17 = smov (!%p229_p3, %s3641_s17), 7 }
   0xe   : > { %s4523_s18 = sshll.u32 %s5230_s17, 6 }
   0xf   : > { %s4529_s21 = scalar_lea.vmem %s5223_s1, %s4523_s18  ;;  %s4541_s24 = scalar_lea.vmem %s5222_s0, %s4523_s18 }
  0x10   : > { %v320_v1 = vld [vmem:[%s4529_s21] sm:$0xff]  ;;  %v321_v2 = vld [vmem:[%s4529_s21 + $0x8] sm:$0xff]  ;;  %v322_v3 = vld [vmem:[%s4529_s21 + $0x10] sm:$0xff]  ;;  %s4959_s9 = scalar_lea.vmem %s5224_s2, %s4523_s18  ;;  %s5153_s12 = scalar_lea.vmem %s5226_s4, %s4523_s18 }
  0x11   : > { %v4186_v4 = vpack.c.bf16 %v321_v2, %v320_v1  ;;  %v323_v5 = vld [vmem:[%s4529_s21 + $0x18] sm:$0xff]  ;;  %v256_v6 = vld [vmem:[%s4541_s24] sm:$0xff]  ;;  %v258_v9 = vld [vmem:[%s4541_s24 + $0x10] sm:$0xff] }
  0x12   : > { %v4192_v7 = vpack.c.bf16 %v323_v5, %v322_v3  ;;  %v288_v8 = vmul.f32 0.35355338, %v256_v6  ;;  %v324_v10 = vld [vmem:[%s4529_s21 + $0x20] sm:$0xff]  ;;  %v290_v11 = vmul.f32 0.35355338, %v258_v9  ;;  %v325_v12 = vld [vmem:[%s4529_s21 + $0x28] sm:$0xff] }
  0x13   : > { %4188 = vmatprep.subr.msk.bf16.mxu0 %vm4533_vm1, %v4186_v4  ;;  %v326_v13 = vld [vmem:[%s4529_s21 + $0x30] sm:$0xff]  ;;  %v327_v14 = vld [vmem:[%s4529_s21 + $0x38] sm:$0xff]  ;;  %v257_v15 = vld [vmem:[%s4541_s24 + $0x8] sm:$0xff]  ;;  %v4198_v16 = vpack.c.bf16 %v325_v12, %v324_v10 }
  0x14   : > { %4194 = vmatprep.subr.msk.bf16.mxu1 %vm4533_vm1, %v4192_v7  ;;  %4191 = vmatpush3.bf16.xpose.msk.msra.mxu0 %vm4533_vm1, %v4186_v4  ;;  %v4204_v17 = vpack.c.bf16 %v327_v14, %v326_v13  ;;  %v259_v18 = vld [vmem:[%s4541_s24 + $0x18] sm:$0xff]  ;;  %v262_v19 = vld [vmem:[%s4541_s24 + $0x30] sm:$0xff]  ;;  %v289_v20 = vmul.f32 0.35355338, %v257_v15  ;;  %v260_v21 = vld [vmem:[%s4541_s24 + $0x20] sm:$0xff] }
  0x15   : > { %4197 = vmatpush3.bf16.xpose.msk.msra.mxu1 %vm4533_vm1, %v4192_v7  ;;  %3966 = vmatprep.mubr.msk.f32.mxu0 %vm384_vm0, %v288_v8  ;;  %v328_v22 = vld [vmem:[%s4529_s21 + $0x40] sm:$0xff]  ;;  %v329_v23 = vld [vmem:[%s4529_s21 + $0x48] sm:$0xff]  ;;  %v291_v24 = vmul.f32 0.35355338, %v259_v18  ;;  %v330_v25 = vld [vmem:[%s4529_s21 + $0x50] sm:$0xff] }
  0x16   : > { %3973 = vmatprep.mubr.msk.f32.mxu1 %vm384_vm0, %v290_v11  ;;  %4200 = vmatprep.subr.msk.bf16.mxu0 %vm4533_vm1, %v4198_v16  ;;  %v331_v26 = vld [vmem:[%s4529_s21 + $0x58] sm:$0xff]  ;;  %v294_v27 = vmul.f32 0.35355338, %v262_v19  ;;  %v292_v28 = vmul.f32 0.35355338, %v260_v21  ;;  %v4210_v29 = vpack.c.bf16 %v329_v23, %v328_v22  ;;  %v261_v31 = vld [vmem:[%s4541_s24 + $0x28] sm:$0xff] }
  0x17   : > { %4206 = vmatprep.subr.msk.bf16.mxu1 %vm4533_vm1, %v4204_v17  ;;  %v4216_v30 = vpack.c.bf16 %v331_v26, %v330_v25  ;;  %v263_v32 = vld [vmem:[%s4541_s24 + $0x38] sm:$0xff]  ;;  %v266_v33 = vld [vmem:[%s4541_s24 + $0x50] sm:$0xff]  ;;  %v293_v34 = vmul.f32 0.35355338, %v261_v31  ;;  %v264_v35 = vld [vmem:[%s4541_s24 + $0x40] sm:$0xff] }
  0x18   : > { %v332_v36 = vld [vmem:[%s4529_s21 + $0x60] sm:$0xff]  ;;  %v333_v37 = vld [vmem:[%s4529_s21 + $0x68] sm:$0xff]  ;;  %v295_v38 = vmul.f32 0.35355338, %v263_v32  ;;  %v334_v39 = vld [vmem:[%s4529_s21 + $0x70] sm:$0xff] }
  0x19   : > { %v335_v40 = vld [vmem:[%s4529_s21 + $0x78] sm:$0xff]  ;;  %v298_v41 = vmul.f32 0.35355338, %v266_v33  ;;  %v296_v42 = vmul.f32 0.35355338, %v264_v35  ;;  %v4222_v43 = vpack.c.bf16 %v333_v37, %v332_v36  ;;  %v265_v45 = vld [vmem:[%s4541_s24 + $0x48] sm:$0xff] }
  0x1a   : > { %v4228_v44 = vpack.c.bf16 %v335_v40, %v334_v39  ;;  %v267_v46 = vld [vmem:[%s4541_s24 + $0x58] sm:$0xff]  ;;  %v270_v47 = vld [vmem:[%s4541_s24 + $0x70] sm:$0xff]  ;;  %v297_v48 = vmul.f32 0.35355338, %v265_v45  ;;  %v268_v49 = vld [vmem:[%s4541_s24 + $0x60] sm:$0xff] }
  0x1b   : > { %3967 = vmatmul.mubr.msk.f32.vlgmr.msra.gmra.mrb[0].mxu0 %vm384_vm0, %v289_v20  ;;  %v336_v50 = vld [vmem:[%s4529_s21 + $0x80] sm:$0xff]  ;;  %v337_v51 = vld [vmem:[%s4529_s21 + $0x88] sm:$0xff]  ;;  %v299_v52 = vmul.f32 0.35355338, %v267_v46  ;;  %v338_v53 = vld [vmem:[%s4529_s21 + $0x90] sm:$0xff] }
  0x1c   : > { %3974 = vmatmul.mubr.msk.f32.vlgmr.msra.gmra.mrb[0].mxu1 %vm384_vm0, %v291_v24  ;;  %4203 = vmatpush3.bf16.xpose.msk.msra.mxu0 %vm4533_vm1, %v4198_v16  ;;  %v339_v54 = vld [vmem:[%s4529_s21 + $0x98] sm:$0xff]  ;;  %v302_v55 = vmul.f32 0.35355338, %v270_v47  ;;  %v300_v56 = vmul.f32 0.35355338, %v268_v49  ;;  %v4234_v57 = vpack.c.bf16 %v337_v51, %v336_v50  ;;  %v269_v59 = vld [vmem:[%s4541_s24 + $0x68] sm:$0xff] }
  0x1d   : > { %4209 = vmatpush3.bf16.xpose.msk.msra.mxu1 %vm4533_vm1, %v4204_v17  ;;  %3987 = vmatprep.mubr.msk.f32.mxu1 %vm384_vm0, %v294_v27  ;;  %v4240_v58 = vpack.c.bf16 %v339_v54, %v338_v53  ;;  %v271_v60 = vld [vmem:[%s4541_s24 + $0x78] sm:$0xff]  ;;  %v274_v61 = vld [vmem:[%s4541_s24 + $0x90] sm:$0xff]  ;;  %v301_v62 = vmul.f32 0.35355338, %v269_v59  ;;  %v272_v63 = vld [vmem:[%s4541_s24 + $0x80] sm:$0xff]  ;;  %v3762_v53 = vunpack.c.h.bf16 %v3819_v0  ;;  %v3761_v54 = vunpack.c.l.bf16 %v3819_v0 }
  0x1e   : > { %3980 = vmatprep.mubr.msk.f32.mxu0 %vm384_vm0, %v292_v28  ;;  %4212 = vmatprep.subr.msk.bf16.mxu0 %vm4533_vm1, %v4210_v29  ;;  %v340_v1 = vld [vmem:[%s4529_s21 + $0xa0] sm:$0xff]  ;;  %v341_v2 = vld [vmem:[%s4529_s21 + $0xa8] sm:$0xff]  ;;  %v303_v3 = vmul.f32 0.35355338, %v271_v60  ;;  %v342_v4 = vld [vmem:[%s4529_s21 + $0xb0] sm:$0xff] }
  0x1f   : > { %4218 = vmatprep.subr.msk.bf16.mxu1 %vm4533_vm1, %v4216_v30  ;;  %v343_v5 = vld [vmem:[%s4529_s21 + $0xb8] sm:$0xff]  ;;  %v306_v6 = vmul.f32 0.35355338, %v274_v61  ;;  %v304_v7 = vmul.f32 0.35355338, %v272_v63  ;;  %v4246_v8 = vpack.c.bf16 %v341_v2, %v340_v1  ;;  %v273_v10 = vld [vmem:[%s4541_s24 + $0x88] sm:$0xff] }
  0x20   : > { %v4252_v9 = vpack.c.bf16 %v343_v5, %v342_v4  ;;  %v275_v11 = vld [vmem:[%s4541_s24 + $0x98] sm:$0xff]  ;;  %v278_v12 = vld [vmem:[%s4541_s24 + $0xb0] sm:$0xff]  ;;  %v305_v13 = vmul.f32 0.35355338, %v273_v10  ;;  %v276_v14 = vld [vmem:[%s4541_s24 + $0xa0] sm:$0xff] }
  0x21   : > { %v344_v15 = vld [vmem:[%s4529_s21 + $0xc0] sm:$0xff]  ;;  %v345_v16 = vld [vmem:[%s4529_s21 + $0xc8] sm:$0xff]  ;;  %v307_v17 = vmul.f32 0.35355338, %v275_v11  ;;  %v346_v18 = vld [vmem:[%s4529_s21 + $0xd0] sm:$0xff] }
  0x22   : > { %v347_v19 = vld [vmem:[%s4529_s21 + $0xd8] sm:$0xff]  ;;  %v310_v20 = vmul.f32 0.35355338, %v278_v12  ;;  %v308_v21 = vmul.f32 0.35355338, %v276_v14  ;;  %v4258_v22 = vpack.c.bf16 %v345_v16, %v344_v15  ;;  %v277_v24 = vld [vmem:[%s4541_s24 + $0xa8] sm:$0xff] }
  0x23   : > { %3981 = vmatmul.mubr.msk.f32.vlgmr.msra.gmra.mrb[2].mxu0 %vm384_vm0, %v293_v34  ;;  %v4264_v23 = vpack.c.bf16 %v347_v19, %v346_v18  ;;  %v279_v25 = vld [vmem:[%s4541_s24 + $0xb8] sm:$0xff]  ;;  %v282_v26 = vld [vmem:[%s4541_s24 + $0xd0] sm:$0xff]  ;;  %v309_v27 = vmul.f32 0.35355338, %v277_v24  ;;  %v280_v28 = vld [vmem:[%s4541_s24 + $0xc0] sm:$0xff] }
  0x24   : > { %3988 = vmatmul.mubr.msk.f32.vlgmr.msra.gmra.mrb[2].mxu1 %vm384_vm0, %v295_v38  ;;  %4215 = vmatpush3.bf16.xpose.msk.msra.mxu0 %vm4533_vm1, %v4210_v29  ;;  %v348_v29 = vld [vmem:[%s4529_s21 + $0xe0] sm:$0xff]  ;;  %v311_v31 = vmul.f32 0.35355338, %v279_v25  ;;  %v350_v32 = vld [vmem:[%s4529_s21 + $0xf0] sm:$0xff]  ;;  %v351_v33 = vld [vmem:[%s4529_s21 + $0xf8] sm:$0xff] }
  0x25   : > { %4221 = vmatpush3.bf16.xpose.msk.msra.mxu1 %vm4533_vm1, %v4216_v30  ;;  %4001 = vmatprep.mubr.msk.f32.mxu1 %vm384_vm0, %v298_v41  ;;  %v349_v30 = vld [vmem:[%s4529_s21 + $0xe8] sm:$0xff]  ;;  %v314_v34 = vmul.f32 0.35355338, %v282_v26  ;;  %v312_v35 = vmul.f32 0.35355338, %v280_v28  ;;  %v4276_v37 = vpack.c.bf16 %v351_v33, %v350_v32  ;;  %v283_v39 = vld [vmem:[%s4541_s24 + $0xd8] sm:$0xff] }
  0x26   : > { %3994 = vmatprep.mubr.msk.f32.mxu0 %vm384_vm0, %v296_v42  ;;  %4224 = vmatprep.subr.msk.bf16.mxu0 %vm4533_vm1, %v4222_v43  ;;  %v4270_v36 = vpack.c.bf16 %v349_v30, %v348_v29  ;;  %v281_v38 = vld [vmem:[%s4541_s24 + $0xc8] sm:$0xff]  ;;  %v284_v40 = vld [vmem:[%s4541_s24 + $0xe0] sm:$0xff]  ;;  %v286_v42 = vld [vmem:[%s4541_s24 + $0xf0] sm:$0xff] }
  0x27   : > { %4230 = vmatprep.subr.msk.bf16.mxu1 %vm4533_vm1, %v4228_v44  ;;  %v313_v41 = vmul.f32 0.35355338, %v281_v38  ;;  %v318_v45 = vmul.f32 0.35355338, %v286_v42  ;;  %v285_v46 = vld [vmem:[%s4541_s24 + $0xe8] sm:$0xff]  ;;  %v287_v47 = vld [vmem:[%s4541_s24 + $0xf8] sm:$0xff] }
  0x28   : > { %v319_v49 = vmul.f32 0.35355338, %v287_v47  ;;  %v3756_v50 = vld [vmem:[%s5225_s3] sm:$0xff]   ;;  %v3821_v2 = vld [vmem:[%s5225_s3 + $0x18] sm:$0xff]  }
  0x29   : > { %v3758_v51 = vunpack.c.h.bf16 %v3756_v50  ;;  %v3825_v38 = vld [vmem:[%s5225_s3 + $0x38] sm:$0xff]  }
  0x2b   : > { %3995 = vmatmul.mubr.msk.f32.vlgmr.msra.gmra.mrb[4].mxu0 %vm384_vm0, %v297_v48  ;;  %v317_v48 = vmul.f32 0.35355338, %v285_v46 }
  0x2c   : > { %4002 = vmatmul.mubr.msk.f32.vlgmr.msra.gmra.mrb[4].mxu1 %vm384_vm0, %v299_v52  ;;  %4227 = vmatpush3.bf16.xpose.msk.msra.mxu0 %vm4533_vm1, %v4222_v43  ;;  %v315_v43 = vmul.f32 0.35355338, %v283_v39  ;;  %v3757_v52 = vunpack.c.l.bf16 %v3756_v50 }
  0x2d   : > { %4233 = vmatpush3.bf16.xpose.msk.msra.mxu1 %vm4533_vm1, %v4228_v44  ;;  %4015 = vmatprep.mubr.msk.f32.mxu1 %vm384_vm0, %v302_v55  ;;  %v316_v44 = vmul.f32 0.35355338, %v284_v40 }
  0x2e   : > { %4008 = vmatprep.mubr.msk.f32.mxu0 %vm384_vm0, %v300_v56  ;;  %4236 = vmatprep.subr.msk.bf16.mxu0 %vm4533_vm1, %v4234_v57 }
  0x2f   : > { %4242 = vmatprep.subr.msk.bf16.mxu1 %vm4533_vm1, %v4240_v58 }
  0x33   : > { %4009 = vmatmul.mubr.msk.f32.vlgmr.msra.gmra.mrb[6].mxu0 %vm384_vm0, %v301_v62  ;;  %v3820_v62 = vld [vmem:[%s5225_s3 + $0x10] sm:$0xff]  }
  0x34   : > { %4016 = vmatmul.mubr.msk.f32.vlgmr.msra.gmra.mrb[6].mxu1 %vm384_vm0, %v303_v3  ;;  %4239 = vmatpush3.bf16.xpose.msk.msra.mxu0 %vm4533_vm1, %v4234_v57  ;;  %v3766_v5 = vunpack.c.h.bf16 %v3820_v62 }
  0x35   : > { %4245 = vmatpush3.bf16.xpose.msk.msra.mxu1 %vm4533_vm1, %v4240_v58  ;;  %4029 = vmatprep.mubr.msk.f32.mxu1 %vm384_vm0, %v306_v6  ;;  %v3770_v6 = vunpack.c.h.bf16 %v3821_v2 }
  0x36   : > { %4022 = vmatprep.mubr.msk.f32.mxu0 %vm384_vm0, %v304_v7  ;;  %4248 = vmatprep.subr.msk.bf16.mxu0 %vm4533_vm1, %v4246_v8 }
  0x37   : > { %4254 = vmatprep.subr.msk.bf16.mxu1 %vm4533_vm1, %v4252_v9 }
  0x3b   : > { %4023 = vmatmul.mubr.msk.f32.vlgmr.msra.gmra.mrb[8].mxu0 %vm384_vm0, %v305_v13 }
  0x3c   : > { %4030 = vmatmul.mubr.msk.f32.vlgmr.msra.gmra.mrb[8].mxu1 %vm384_vm0, %v307_v17  ;;  %4251 = vmatpush3.bf16.xpose.msk.msra.mxu0 %vm4533_vm1, %v4246_v8  ;;  %v3765_v8 = vunpack.c.l.bf16 %v3820_v62  ;;  %v3822_v17 = vld [vmem:[%s5225_s3 + $0x20] sm:$0xff]  }
  0x3d   : > { %4257 = vmatpush3.bf16.xpose.msk.msra.mxu1 %vm4533_vm1, %v4252_v9  ;;  %4043 = vmatprep.mubr.msk.f32.mxu1 %vm384_vm0, %v310_v20  ;;  %v3769_v9 = vunpack.c.l.bf16 %v3821_v2  ;;  %v3823_v20 = vld [vmem:[%s5225_s3 + $0x28] sm:$0xff]   ;;  %v3773_v26 = vunpack.c.l.bf16 %v3822_v17 }
  0x3e   : > { %4036 = vmatprep.mubr.msk.f32.mxu0 %vm384_vm0, %v308_v21  ;;  %4260 = vmatprep.subr.msk.bf16.mxu0 %vm4533_vm1, %v4258_v22 }
  0x3f   : > { %4266 = vmatprep.subr.msk.bf16.mxu1 %vm4533_vm1, %v4264_v23 }
  0x43   : > { %4037 = vmatmul.mubr.msk.f32.vlgmr.msra.gmra.mrb[10].mxu0 %vm384_vm0, %v309_v27  ;;  %v3777_v27 = vunpack.c.l.bf16 %v3823_v20 }
  0x44   : > { %4044 = vmatmul.mubr.msk.f32.vlgmr.msra.gmra.mrb[10].mxu1 %vm384_vm0, %v311_v31  ;;  %4263 = vmatpush3.bf16.xpose.msk.msra.mxu0 %vm4533_vm1, %v4258_v22  ;;  %v3774_v22 = vunpack.c.h.bf16 %v3822_v17  ;;  %v3829_v17 = vld [vmem:[%s5225_s3 + $0x58] sm:$0xff]  }
  0x45   : > { %4269 = vmatpush3.bf16.xpose.msk.msra.mxu1 %vm4533_vm1, %v4264_v23  ;;  %4057 = vmatprep.mubr.msk.f32.mxu1 %vm384_vm0, %v314_v34  ;;  %v3778_v23 = vunpack.c.h.bf16 %v3823_v20 }
  0x46   : > { %4050 = vmatprep.mubr.msk.f32.mxu0 %vm384_vm0, %v312_v35  ;;  %4272 = vmatprep.subr.msk.bf16.mxu0 %vm4533_vm1, %v4270_v36  ;;  %v3824_v35 = vld [vmem:[%s5225_s3 + $0x30] sm:$0xff]  }
  0x47   : > { %4278 = vmatprep.subr.msk.bf16.mxu1 %vm4533_vm1, %v4276_v37  ;;  %v3782_v40 = vunpack.c.h.bf16 %v3824_v35 }
  0x4b   : > { %4051 = vmatmul.mubr.msk.f32.vlgmr.msra.gmra.mrb[12].mxu0 %vm384_vm0, %v313_v41  ;;  %v3786_v41 = vunpack.c.h.bf16 %v3825_v38 }
  0x4c   : > { %4058 = vmatmul.mubr.msk.f32.vlgmr.msra.gmra.mrb[12].mxu1 %vm384_vm0, %v315_v43  ;;  %4275 = vmatpush3.bf16.xpose.msk.msra.mxu0 %vm4533_vm1, %v4270_v36 }
  0x4d   : > { %4281 = vmatpush3.bf16.xpose.msk.msra.mxu1 %vm4533_vm1, %v4276_v37  ;;  %4064 = vmatprep.mubr.msk.f32.mxu0 %vm384_vm0, %v316_v44  ;;  %v3781_v44 = vunpack.c.l.bf16 %v3824_v35 }
  0x4e   : > { %4071 = vmatprep.mubr.msk.f32.mxu1 %vm384_vm0, %v318_v45  ;;  %v3785_v45 = vunpack.c.l.bf16 %v3825_v38 }
  0x53   : > { %4065 = vmatmul.mubr.msk.f32.vlgmr.msra.gmra.mrb[14].mxu0 %vm384_vm0, %v317_v48 }
  0x54   : > { %4072 = vmatmul.mubr.msk.f32.vlgmr.msra.gmra.mrb[14].mxu1 %vm384_vm0, %v319_v49 }
  0xee   : > { %v3968_v55 = vpop.f32.mrb[0].mxu0 }
  0xef   : > { %v4709_v56 = vadd.f32 %v3968_v55, %v3758_v51  ;;  %v463_v57 = vpop.f32.mrb[1].mxu0  ;;  %v3975_v58 = vpop.f32.mrb[0].mxu1  ;;  %v3827_v55 = vld [vmem:[%s5225_s3 + $0x48] sm:$0xff]  }
  0xf0   : > { %v4711_v59 = vadd.f32 %v3757_v52, %v463_v57  ;;  %v4713_v60 = vadd.f32 %v3975_v58, %v3762_v53  ;;  %v550_v61 = vpop.f32.mrb[1].mxu1  ;;  %v3826_v52 = vld [vmem:[%s5225_s3 + $0x40] sm:$0xff]  }
  0xf1   : > { %v4718_v63 = vadd.f32 %v3761_v54, %v550_v61  ;;  %v1877_v1 = vsel %vm1873_vm2, %v4709_v56, -inf  ;;  %v3790_v58 = vunpack.c.h.bf16 %v3826_v52  ;;  %v3794_v61 = vunpack.c.h.bf16 %v3827_v55 }
  0xf2   : > { %1878 = vmax.xlane.f32.xlu1 %v1877_v1  ;;  %v1874_v3 = vsel %vm1873_vm2, %v4711_v59, -inf  ;;  %v1883_v4 = vsel %vm1873_vm2, %v4713_v60, -inf  ;;  %v3789_v2 = vunpack.c.l.bf16 %v3826_v52 }
  0xf3   : > { %1875 = vmax.xlane.f32.xlu0 %v1874_v3  ;;  %v1880_v7 = vsel %vm1873_vm2, %v4718_v63, -inf  ;;  %v3793_v3 = vunpack.c.l.bf16 %v3827_v55 }
  0xf6   : > { %1884 = vmax.xlane.f32.xlu1 %v1883_v4  ;;  %v3982_v10 = vpop.f32.mrb[2].mxu0 }
  0xf7   : > { %v3989_v11 = vpop.f32.mrb[2].mxu1  ;;  %1881 = vmax.xlane.f32.xlu0 %v1880_v7  ;;  %v4731_v12 = vadd.f32 %v3982_v10, %v3766_v5  ;;  %v637_v13 = vpop.f32.mrb[3].mxu0 }
  0xf8   : > { %v4733_v14 = vadd.f32 %v3989_v11, %v3770_v6  ;;  %v724_v15 = vpop.f32.mrb[3].mxu1  ;;  %v4735_v16 = vadd.f32 %v3765_v8, %v637_v13  ;;  %v3828_v11 = vld [vmem:[%s5225_s3 + $0x50] sm:$0xff]  }
  0xf9   : > { %v4740_v18 = vadd.f32 %v3769_v9, %v724_v15  ;;  %v1889_v19 = vsel %vm1873_vm2, %v4731_v12, -inf  ;;  %v3798_v20 = vunpack.c.h.bf16 %v3828_v11 }
  0xfa   : > { %v1895_v21 = vsel %vm1873_vm2, %v4733_v14, -inf  ;;  %v1886_v25 = vsel %vm1873_vm2, %v4735_v16, -inf }
  0xfb   : > { %1896 = vmax.xlane.f32.xlu1 %v1895_v21  ;;  %1890 = vmax.xlane.f32.xlu0 %v1889_v19  ;;  %v1892_v24 = vsel %vm1873_vm2, %v4740_v18, -inf  ;;  %v3802_v21 = vunpack.c.h.bf16 %v3829_v17 }
  0xfe   : > { %v3996_v28 = vpop.f32.mrb[4].mxu0 }
  0xff   : > { %v4003_v29 = vpop.f32.mrb[4].mxu1  ;;  %1893 = vmax.xlane.f32.xlu1 %v1892_v24  ;;  %1887 = vmax.xlane.f32.xlu0 %v1886_v25  ;;  %v4753_v30 = vadd.f32 %v3996_v28, %v3774_v22  ;;  %v811_v31 = vpop.f32.mrb[5].mxu0  ;;  %v3797_v24 = vunpack.c.l.bf16 %v3828_v11  ;;  %v3801_v25 = vunpack.c.l.bf16 %v3829_v17 }
 0x100   : > { %v4755_v32 = vadd.f32 %v4003_v29, %v3778_v23  ;;  %v898_v33 = vpop.f32.mrb[5].mxu1  ;;  %v4757_v34 = vadd.f32 %v3773_v26, %v811_v31 }
 0x101   : > { %v4762_v36 = vadd.f32 %v3777_v27, %v898_v33  ;;  %v1901_v37 = vsel %vm1873_vm2, %v4753_v30, -inf }
 0x102   : > { %v1907_v39 = vsel %vm1873_vm2, %v4755_v32, -inf  ;;  %v1898_v43 = vsel %vm1873_vm2, %v4757_v34, -inf }
 0x103   : > { %1908 = vmax.xlane.f32.xlu1 %v1907_v39  ;;  %1902 = vmax.xlane.f32.xlu0 %v1901_v37  ;;  %v1904_v42 = vsel %vm1873_vm2, %v4762_v36, -inf  ;;  %v3830_v37 = vld [vmem:[%s5225_s3 + $0x60] sm:$0xff]  }
 0x106   : > { %v4010_v46 = vpop.f32.mrb[6].mxu0 }
 0x107   : > { %v4017_v47 = vpop.f32.mrb[6].mxu1  ;;  %1905 = vmax.xlane.f32.xlu1 %v1904_v42  ;;  %1899 = vmax.xlane.f32.xlu0 %v1898_v43  ;;  %v4775_v48 = vadd.f32 %v4010_v46, %v3782_v40  ;;  %v985_v49 = vpop.f32.mrb[7].mxu0  ;;  %v3831_v40 = vld [vmem:[%s5225_s3 + $0x68] sm:$0xff]   ;;  %v3806_v42 = vunpack.c.h.bf16 %v3830_v37  ;;  %v3805_v46 = vunpack.c.l.bf16 %v3830_v37 }
 0x108   : > { %v4777_v50 = vadd.f32 %v4017_v47, %v3786_v41  ;;  %v1072_v0 = vpop.f32.mrb[7].mxu1  ;;  %v4779_v51 = vadd.f32 %v3781_v44, %v985_v49  ;;  %v3810_v43 = vunpack.c.h.bf16 %v3831_v40  ;;  %v3809_v47 = vunpack.c.l.bf16 %v3831_v40 }
 0x109   : > { %v4784_v53 = vadd.f32 %v3785_v45, %v1072_v0  ;;  %v1913_v54 = vsel %vm1873_vm2, %v4775_v48, -inf }
 0x10a   : > { %v1919_v57 = vsel %vm1873_vm2, %v4777_v50, -inf  ;;  %v1910_v1 = vsel %vm1873_vm2, %v4779_v51, -inf }
 0x10b   : > { %1920 = vmax.xlane.f32.xlu1 %v1919_v57  ;;  %1914 = vmax.xlane.f32.xlu0 %v1913_v54  ;;  %v1916_v62 = vsel %vm1873_vm2, %v4784_v53, -inf }
 0x10e   : > { %v4024_v4 = vpop.f32.mrb[8].mxu0 }
 0x10f   : > { %v4031_v5 = vpop.f32.mrb[8].mxu1  ;;  %1917 = vmax.xlane.f32.xlu1 %v1916_v62  ;;  %1911 = vmax.xlane.f32.xlu0 %v1910_v1  ;;  %v4797_v6 = vadd.f32 %v4024_v4, %v3790_v58  ;;  %v1159_v7 = vpop.f32.mrb[9].mxu0  ;;  %v3832_v1 = vld [vmem:[%s5225_s3 + $0x70] sm:$0xff]  }
 0x110   : > { %v4799_v8 = vadd.f32 %v4031_v5, %v3794_v61  ;;  %v1246_v9 = vpop.f32.mrb[9].mxu1  ;;  %v4801_v10 = vadd.f32 %v3789_v2, %v1159_v7  ;;  %v3813_v7 = vunpack.c.l.bf16 %v3832_v1 }
 0x111   : > { %v4806_v13 = vadd.f32 %v3793_v3, %v1246_v9  ;;  %v1925_v15 = vsel %vm1873_vm2, %v4797_v6, -inf  ;;  %v3833_v3 = vld [vmem:[%s5225_s3 + $0x78] sm:$0xff]  }
 0x112   : > { %v1931_v19 = vsel %vm1873_vm2, %v4799_v8, -inf  ;;  %v1922_v23 = vsel %vm1873_vm2, %v4801_v10, -inf  ;;  %v3817_v9 = vunpack.c.l.bf16 %v3833_v3 }
 0x113   : > { %1932 = vmax.xlane.f32.xlu1 %v1931_v19  ;;  %1926 = vmax.xlane.f32.xlu0 %v1925_v15  ;;  %v1928_v22 = vsel %vm1873_vm2, %v4806_v13, -inf  ;;  %v3814_v15 = vunpack.c.h.bf16 %v3832_v1  ;;  %v3818_v19 = vunpack.c.h.bf16 %v3833_v3 }
 0x116   : > { %v4038_v26 = vpop.f32.mrb[10].mxu0 }
 0x117   : > { %v4045_v27 = vpop.f32.mrb[10].mxu1  ;;  %1929 = vmax.xlane.f32.xlu1 %v1928_v22  ;;  %1923 = vmax.xlane.f32.xlu0 %v1922_v23  ;;  %v4819_v28 = vadd.f32 %v4038_v26, %v3798_v20  ;;  %v1333_v29 = vpop.f32.mrb[11].mxu0 }
 0x118   : > { %v4821_v31 = vadd.f32 %v4045_v27, %v3802_v21  ;;  %v1420_v33 = vpop.f32.mrb[11].mxu1  ;;  %v4823_v35 = vadd.f32 %v3797_v24, %v1333_v29 }
 0x119   : > { %v4828_v38 = vadd.f32 %v3801_v25, %v1420_v33  ;;  %v1937_v39 = vsel %vm1873_vm2, %v4819_v28, -inf }
 0x11a   : > { %v1943_v41 = vsel %vm1873_vm2, %v4821_v31, -inf  ;;  %v1934_v45 = vsel %vm1873_vm2, %v4823_v35, -inf }
 0x11b   : > { %1944 = vmax.xlane.f32.xlu1 %v1943_v41  ;;  %1938 = vmax.xlane.f32.xlu0 %v1937_v39  ;;  %v1940_v44 = vsel %vm1873_vm2, %v4828_v38, -inf }
 0x11e   : > { %v4052_v49 = vpop.f32.mrb[12].mxu0 }
 0x11f   : > { %v4059_v0 = vpop.f32.mrb[12].mxu1  ;;  %1941 = vmax.xlane.f32.xlu1 %v1940_v44  ;;  %1935 = vmax.xlane.f32.xlu0 %v1934_v45  ;;  %v4841_v52 = vadd.f32 %v4052_v49, %v3806_v42  ;;  %v1507_v54 = vpop.f32.mrb[13].mxu0 }
 0x120   : > { %v4843_v55 = vadd.f32 %v4059_v0, %v3810_v43  ;;  %v1594_v57 = vpop.f32.mrb[13].mxu1  ;;  %v4845_v58 = vadd.f32 %v3805_v46, %v1507_v54 }
 0x121   : > { %v4847_v61 = vadd.f32 %v3809_v47, %v1594_v57  ;;  %v1949_v62 = vsel %vm1873_vm2, %v4841_v52, -inf }
 0x122   : > { %v1955_v2 = vsel %vm1873_vm2, %v4843_v55, -inf  ;;  %v1946_v5 = vsel %vm1873_vm2, %v4845_v58, -inf }
 0x123   : > { %1956 = vmax.xlane.f32.xlu1 %v1955_v2  ;;  %1950 = vmax.xlane.f32.xlu0 %v1949_v62  ;;  %v1952_v4 = vsel %vm1873_vm2, %v4847_v61, -inf }
 0x126   : > { %v4066_v11 = vpop.f32.mrb[14].mxu0 }
 0x127   : > { %v4073_v17 = vpop.f32.mrb[14].mxu1  ;;  %1953 = vmax.xlane.f32.xlu1 %v1952_v4  ;;  %1947 = vmax.xlane.f32.xlu0 %v1946_v5  ;;  %v1681_v20 = vpop.f32.mrb[15].mxu0  ;;  %v4867_v24 = vadd.f32 %v4066_v11, %v3814_v15 }
 0x128   : > { %v1768_v21 = vpop.f32.mrb[15].mxu1  ;;  %v4863_v22 = vadd.f32 %v3813_v7, %v1681_v20  ;;  %v4871_v26 = vadd.f32 %v4073_v17, %v3818_v19 }
 0x129   : > { %v4865_v23 = vadd.f32 %v3817_v9, %v1768_v21  ;;  %v1961_v29 = vsel %vm1873_vm2, %v4867_v24, -inf }
 0x12a   : > { %v1958_v25 = vsel %vm1873_vm2, %v4863_v22, -inf  ;;  %v1967_v33 = vsel %vm1873_vm2, %v4871_v26, -inf }
 0x12b   : > { %v1964_v27 = vsel %vm1873_vm2, %v4865_v23, -inf  ;;  %1959 = vmax.xlane.f32.xlu0 %v1958_v25 }
 0x12c   : > { %1965 = vmax.xlane.f32.xlu1 %v1964_v27 }
 0x12f   : > { %1962 = vmax.xlane.f32.xlu0 %v1961_v29 }
 0x130   : > { %1968 = vmax.xlane.f32.xlu1 %v1967_v33 }
 0x17f   : > { %v1879_v37 = vpop.xlane.xlu1 %1878 }
 0x180   : > { %v1971_v39 = vsub.f32 %v4709_v56, %v1879_v37  ;;  %v1876_v40 = vpop.xlane.xlu0 %1875 }
 0x181   : > { %v1970_v41 = vsub.f32 %v4711_v59, %v1876_v40 }
 0x182   : > { %v2004_v42 = vmul.f32 1.442695, %v1971_v39 }
 0x183   : > { %v2002_v43 = vmul.f32 1.442695, %v1970_v41  ;;  %v1885_v44 = vpop.xlane.xlu1 %1884 }
 0x184   : > { %4354 = vpow2.f32 %v2004_v42  ;;  %v1973_v45 = vsub.f32 %v4713_v60, %v1885_v44  ;;  %v1882_v46 = vpop.xlane.xlu0 %1881 }
 0x185   : > { %v1972_v47 = vsub.f32 %v4718_v63, %v1882_v46  ;;  %4356 = vpow2.f32 %v2002_v43 }
 0x186   : > { %v2008_v49 = vmul.f32 1.442695, %v1973_v45 }
 0x187   : > { %v2006_v0 = vmul.f32 1.442695, %v1972_v47 }
 0x188   : > { %4358 = vpow2.f32 %v2008_v49  ;;  %v1897_v54 = vpop.xlane.xlu1 %1896  ;;  %v1891_v57 = vpop.xlane.xlu0 %1890 }
 0x189   : > { %v1977_v56 = vsub.f32 %v4733_v14, %v1897_v54  ;;  %v1975_v62 = vsub.f32 %v4731_v12, %v1891_v57  ;;  %4360 = vpow2.f32 %v2006_v0 }
 0x18b   : > { %v2016_v59 = vmul.f32 1.442695, %v1977_v56  ;;  %v2012_v1 = vmul.f32 1.442695, %v1975_v62 }
 0x18c   : > { %v1894_v2 = vpop.xlane.xlu1 %1893  ;;  %v1888_v3 = vpop.xlane.xlu0 %1887 }
 0x18d   : > { %4362 = vpow2.f32 %v2016_v59  ;;  %v1976_v60 = vsub.f32 %v4740_v18, %v1894_v2  ;;  %v1974_v63 = vsub.f32 %v4735_v16, %v1888_v3 }
 0x18e   : > { %v4887_v4 = vpop.eup %4354  ;;  %4364 = vpow2.f32 %v2012_v1 }
 0x18f   : > { %v2014_v5 = vmul.f32 1.442695, %v1976_v60  ;;  %v2010_v7 = vmul.f32 1.442695, %v1974_v63  ;;  %v2069_v14 = vsel %vm1873_vm2, %v4887_v4, 0.0  ;;  %v4891_v9 = vpop.eup %4356 }
 0x190   : > { %v1909_v12 = vpop.xlane.xlu1 %1908  ;;  %v1903_v11 = vpop.xlane.xlu0 %1902  ;;  %2070 = vadd.xlane.f32.xlu0 %v2069_v14  ;;  %v2066_v21 = vsel %vm1873_vm2, %v4891_v9, 0.0 }
 0x191   : > { %4366 = vpow2.f32 %v2014_v5  ;;  %v1981_v15 = vsub.f32 %v4755_v32, %v1909_v12  ;;  %v1979_v18 = vsub.f32 %v4753_v30, %v1903_v11 }
 0x192   : > { %v4895_v17 = vpop.eup %4358  ;;  %4368 = vpow2.f32 %v2010_v7 }
 0x193   : > { %v2024_v16 = vmul.f32 1.442695, %v1981_v15  ;;  %v2020_v19 = vmul.f32 1.442695, %v1979_v18  ;;  %v2075_v20 = vsel %vm1873_vm2, %v4895_v17, 0.0  ;;  %v4901_v25 = vpop.eup %4360 }
 0x194   : > { %v1906_v27 = vpop.xlane.xlu1 %1905  ;;  %2076 = vadd.xlane.f32.xlu1 %v2075_v20  ;;  %v1900_v29 = vpop.xlane.xlu0 %1899  ;;  %2067 = vadd.xlane.f32.xlu0 %v2066_v21  ;;  %v2072_v40 = vsel %vm1873_vm2, %v4901_v25, 0.0 }
 0x195   : > { %4370 = vpow2.f32 %v2024_v16  ;;  %v1980_v30 = vsub.f32 %v4762_v36, %v1906_v27  ;;  %v1978_v32 = vsub.f32 %v4757_v34, %v1900_v29 }
 0x196   : > { %4372 = vpow2.f32 %v2020_v19 }
 0x197   : > { %v4905_v33 = vpop.eup %4362  ;;  %v2022_v37 = vmul.f32 1.442695, %v1980_v30  ;;  %v2018_v39 = vmul.f32 1.442695, %v1978_v32 }
 0x198   : > { %v4909_v41 = vpop.eup %4364  ;;  %v1921_v42 = vpop.xlane.xlu1 %1920  ;;  %2073 = vadd.xlane.f32.xlu1 %v2072_v40  ;;  %v2087_v49 = vsel %vm1873_vm2, %v4905_v33, 0.0  ;;  %v352_v40 = vld [vmem:[%s4959_s9] sm:$0xff] }
 0x199   : > { %v1915_v43 = vpop.xlane.xlu0 %1914  ;;  %4374 = vpow2.f32 %v2022_v37  ;;  %v1985_v44 = vsub.f32 %v4777_v50, %v1921_v42  ;;  %v2081_v34 = vsel %vm1873_vm2, %v4909_v41, 0.0  ;;  %v353_v42 = vld [vmem:[%s4959_s9 + $0x8] sm:$0xff] }
 0x19a   : > { %v1983_v36 = vsub.f32 %v4775_v48, %v1915_v43  ;;  %4376 = vpow2.f32 %v2018_v39  ;;  %2082 = vadd.xlane.f32.xlu0 %v2081_v34 }
 0x19b   : > { %v4915_v45 = vpop.eup %4366  ;;  %v2032_v46 = vmul.f32 1.442695, %v1985_v44 }
 0x19c   : > { %v2028_v47 = vmul.f32 1.442695, %v1983_v36  ;;  %v4919_v0 = vpop.eup %4368  ;;  %v1918_v54 = vpop.xlane.xlu1 %1917  ;;  %2088 = vadd.xlane.f32.xlu1 %v2087_v49  ;;  %v2084_v2 = vsel %vm1873_vm2, %v4915_v45, 0.0  ;;  %v4282_v36 = vpack.c.bf16 %v353_v42, %v352_v40 }
 0x19d   : > { %v1912_v57 = vpop.xlane.xlu0 %1911  ;;  %4378 = vpow2.f32 %v2032_v46  ;;  %v1984_v48 = vsub.f32 %v4784_v53, %v1918_v54  ;;  %v2078_v56 = vsel %vm1873_vm2, %v4919_v0, 0.0 }
 0x19e   : > { %v1982_v50 = vsub.f32 %v4779_v51, %v1912_v57  ;;  %4380 = vpow2.f32 %v2028_v47  ;;  %2079 = vadd.xlane.f32.xlu0 %v2078_v56  ;;  %4283 = vmatprep.subr.bf16.mxu0 %v4282_v36 }
 0x19f   : > { %v4925_v62 = vpop.eup %4370  ;;  %v2030_v59 = vmul.f32 1.442695, %v1984_v48  ;;  %4285 = vmatpush3.bf16.msra.mxu0 %v4282_v36  ;;  %v354_v48 = vld [vmem:[%s4959_s9 + $0x10] sm:$0xff] }
 0x1a0   : > { %v2026_v1 = vmul.f32 1.442695, %v1982_v50  ;;  %v4929_v3 = vpop.eup %4372  ;;  %v1933_v60 = vpop.xlane.xlu1 %1932  ;;  %2085 = vadd.xlane.f32.xlu1 %v2084_v2  ;;  %v2099_v11 = vsel %vm1873_vm2, %v4925_v62, 0.0  ;;  %v355_v50 = vld [vmem:[%s4959_s9 + $0x18] sm:$0xff] }
 0x1a1   : > { %v1927_v63 = vpop.xlane.xlu0 %1926  ;;  %4382 = vpow2.f32 %v2030_v59  ;;  %v1989_v51 = vsub.f32 %v4799_v8, %v1933_v60  ;;  %v2093_v5 = vsel %vm1873_vm2, %v4929_v3, 0.0  ;;  %v4286_v60 = vpack.c.bf16 %v355_v50, %v354_v48 }
 0x1a2   : > { %v1987_v53 = vsub.f32 %v4797_v6, %v1927_v63  ;;  %4384 = vpow2.f32 %v2026_v1  ;;  %2094 = vadd.xlane.f32.xlu0 %v2093_v5 }
 0x1a3   : > { %v4935_v7 = vpop.eup %4374  ;;  %v2040_v14 = vmul.f32 1.442695, %v1989_v51  ;;  %4287 = vmatprep.subr.bf16.mxu1 %v4286_v60 }
 0x1a4   : > { %v2036_v12 = vmul.f32 1.442695, %v1987_v53  ;;  %v4939_v15 = vpop.eup %4376  ;;  %v1930_v18 = vpop.xlane.xlu1 %1929  ;;  %2100 = vadd.xlane.f32.xlu1 %v2099_v11  ;;  %v2096_v29 = vsel %vm1873_vm2, %v4935_v7, 0.0  ;;  %4289 = vmatpush3.bf16.msra.mxu1 %v4286_v60 }
 0x1a5   : > { %v1924_v16 = vpop.xlane.xlu0 %1923  ;;  %4386 = vpow2.f32 %v2040_v14  ;;  %v1988_v6 = vsub.f32 %v4806_v13, %v1930_v18  ;;  %v2090_v19 = vsel %vm1873_vm2, %v4939_v15, 0.0 }
 0x1a6   : > { %v1986_v8 = vsub.f32 %v4801_v10, %v1924_v16  ;;  %4388 = vpow2.f32 %v2036_v12  ;;  %2091 = vadd.xlane.f32.xlu0 %v2090_v19  ;;  %v356_v16 = vld [vmem:[%s4959_s9 + $0x20] sm:$0xff] }
 0x1a7   : > { %v4945_v20 = vpop.eup %4378  ;;  %v2038_v21 = vmul.f32 1.442695, %v1988_v6 }
 0x1a8   : > { %v2034_v27 = vmul.f32 1.442695, %v1986_v8  ;;  %v4949_v30 = vpop.eup %4380  ;;  %v1945_v32 = vpop.xlane.xlu1 %1944  ;;  %2097 = vadd.xlane.f32.xlu1 %v2096_v29 }
 0x1a9   : > { %v1939_v13 = vpop.xlane.xlu0 %1938  ;;  %4390 = vpow2.f32 %v2038_v21  ;;  %v1993_v10 = vsub.f32 %v4821_v31, %v1945_v32  ;;  %v2105_v39 = vsel %vm1873_vm2, %v4949_v30, 0.0  ;;  %v358_v32 = vld [vmem:[%s4959_s9 + $0x30] sm:$0xff] }
 0x1aa   : > { %v1991_v37 = vsub.f32 %v4819_v28, %v1939_v13  ;;  %4392 = vpow2.f32 %v2034_v27  ;;  %2106 = vadd.xlane.f32.xlu0 %v2105_v39  ;;  %v2111_v28 = vsel %vm1873_vm2, %v4945_v20, 0.0  ;;  %v359_v13 = vld [vmem:[%s4959_s9 + $0x38] sm:$0xff] }
 0x1ab   : > { %v4963_v43 = vpop.eup %4382  ;;  %v2048_v44 = vmul.f32 1.442695, %v1993_v10  ;;  %v5006_v42 = vpack.c.bf16 %v359_v13, %v358_v32 }
 0x1ac   : > { %v2044_v31 = vmul.f32 1.442695, %v1991_v37  ;;  %v4967_v34 = vpop.eup %4384  ;;  %v1942_v46 = vpop.xlane.xlu1 %1941  ;;  %2112 = vadd.xlane.f32.xlu1 %v2111_v28  ;;  %v2108_v2 = vsel %vm1873_vm2, %v4963_v43, 0.0 }
 0x1ad   : > { %v1936_v47 = vpop.xlane.xlu0 %1935  ;;  %4394 = vpow2.f32 %v2048_v44  ;;  %v1992_v49 = vsub.f32 %v4828_v38, %v1942_v46  ;;  %v2102_v57 = vsel %vm1873_vm2, %v4967_v34, 0.0  ;;  %4295 = vmatprep.subr.bf16.mxu1 %v5006_v42 }
 0x1ae   : > { %v1990_v54 = vsub.f32 %v4823_v35, %v1936_v47  ;;  %4396 = vpow2.f32 %v2044_v31  ;;  %2103 = vadd.xlane.f32.xlu0 %v2102_v57 }
 0x1af   : > { %v4975_v56 = vpop.eup %4386  ;;  %v2046_v59 = vmul.f32 1.442695, %v1992_v49 }
 0x1b0   : > { %v2042_v1 = vmul.f32 1.442695, %v1990_v54  ;;  %v4979_v38 = vpop.eup %4388  ;;  %v1957_v35 = vpop.xlane.xlu1 %1956  ;;  %2109 = vadd.xlane.f32.xlu1 %v2108_v2  ;;  %v2123_v14 = vsel %vm1873_vm2, %v4975_v56, 0.0 }
 0x1b1   : > { %v1951_v63 = vpop.xlane.xlu0 %1950  ;;  %4398 = vpow2.f32 %v2046_v59  ;;  %v1997_v51 = vsub.f32 %v4843_v55, %v1957_v35  ;;  %v2117_v5 = vsel %vm1873_vm2, %v4979_v38, 0.0  ;;  %v357_v55 = vld [vmem:[%s4959_s9 + $0x28] sm:$0xff] }
 0x1b2   : > { %v1995_v53 = vsub.f32 %v4841_v52, %v1951_v63  ;;  %4400 = vpow2.f32 %v2042_v1  ;;  %2118 = vadd.xlane.f32.xlu0 %v2117_v5  ;;  %v4993_v19 = vpack.c.bf16 %v357_v55, %v356_v16 }
 0x1b3   : > { %v4987_v12 = vpop.eup %4390  ;;  %v2056_v11 = vmul.f32 1.442695, %v1997_v51 }
 0x1b4   : > { %v2052_v18 = vmul.f32 1.442695, %v1995_v53  ;;  %v4991_v6 = vpop.eup %4392  ;;  %v1954_v52 = vpop.xlane.xlu1 %1953  ;;  %2124 = vadd.xlane.f32.xlu1 %v2123_v14  ;;  %4291 = vmatprep.subr.bf16.mxu0 %v4993_v19  ;;  %v2120_v40 = vsel %vm1873_vm2, %v4987_v12, 0.0 }
 0x1b5   : > { %v1948_v8 = vpop.xlane.xlu0 %1947  ;;  %4402 = vpow2.f32 %v2056_v11  ;;  %v1996_v21 = vsub.f32 %v4847_v61, %v1954_v52  ;;  %v2114_v29 = vsel %vm1873_vm2, %v4991_v6, 0.0 }
 0x1b6   : > { %v1994_v27 = vsub.f32 %v4845_v58, %v1948_v8  ;;  %4404 = vpow2.f32 %v2052_v18  ;;  %2115 = vadd.xlane.f32.xlu0 %v2114_v29 }
 0x1b7   : > { %v5002_v10 = vpop.eup %4394  ;;  %v2054_v37 = vmul.f32 1.442695, %v1996_v21 }
 0x1b8   : > { %v2050_v39 = vmul.f32 1.442695, %v1994_v27  ;;  %v5008_v61 = vpop.eup %4396  ;;  %2121 = vadd.xlane.f32.xlu1 %v2120_v40  ;;  %v2135_v49 = vsel %vm1873_vm2, %v5002_v10, 0.0 }
 0x1b9   : > { %v1960_v58 = vpop.xlane.xlu0 %1959  ;;  %4406 = vpow2.f32 %v2054_v37  ;;  %v1966_v44 = vpop.xlane.xlu1 %1965  ;;  %v2129_v28 = vsel %vm1873_vm2, %v5008_v61, 0.0 }
 0x1ba   : > { %v1998_v31 = vsub.f32 %v4863_v22, %v1960_v58  ;;  %4408 = vpow2.f32 %v2050_v39  ;;  %v2000_v36 = vsub.f32 %v4865_v23, %v1966_v44  ;;  %2130 = vadd.xlane.f32.xlu0 %v2129_v28  ;;  %v361_v28 = vld [vmem:[%s4959_s9 + $0x48] sm:$0xff] }
 0x1bb   : > { %v5015_v46 = vpop.eup %4398 }
 0x1bc   : > { %v2058_v47 = vmul.f32 1.442695, %v1998_v31  ;;  %v5019_v54 = vpop.eup %4400  ;;  %v2062_v57 = vmul.f32 1.442695, %v2000_v36  ;;  %2136 = vadd.xlane.f32.xlu1 %v2135_v49  ;;  %v2132_v60 = vsel %vm1873_vm2, %v5015_v46, 0.0  ;;  %v360_v31 = vld [vmem:[%s4959_s9 + $0x40] sm:$0xff] }
 0x1bd   : > { %v1963_v22 = vpop.xlane.xlu0 %1962  ;;  %v1969_v48 = vpop.xlane.xlu1 %1968  ;;  %v2126_v59 = vsel %vm1873_vm2, %v5019_v54, 0.0 }
 0x1be   : > { %4410 = vpow2.f32 %v2058_v47  ;;  %v1999_v50 = vsub.f32 %v4867_v24, %v1963_v22  ;;  %v2001_v23 = vsub.f32 %v4871_v26, %v1969_v48  ;;  %2127 = vadd.xlane.f32.xlu0 %v2126_v59  ;;  %v362_v59 = vld [vmem:[%s4959_s9 + $0x50] sm:$0xff] }
 0x1bf   : > { %4412 = vpow2.f32 %v2062_v57  ;;  %v5025_v1 = vpop.eup %4402 }
 0x1c0   : > { %v2060_v2 = vmul.f32 1.442695, %v1999_v50  ;;  %v5029_v35 = vpop.eup %4404  ;;  %v2064_v63 = vmul.f32 1.442695, %v2001_v23  ;;  %2133 = vadd.xlane.f32.xlu1 %v2132_v60  ;;  %v2147_v26 = vsel %vm1873_vm2, %v5025_v1, 0.0  ;;  %v4298_v50 = vpack.c.bf16 %v361_v28, %v360_v31  ;;  %v363_v23 = vld [vmem:[%s4959_s9 + $0x58] sm:$0xff] }
 0x1c1   : > { %v2141_v24 = vsel %vm1873_vm2, %v5029_v35, 0.0 }
 0x1c2   : > { %4414 = vpow2.f32 %v2060_v2  ;;  %2142 = vadd.xlane.f32.xlu0 %v2141_v24 }
 0x1c3   : > { %4416 = vpow2.f32 %v2064_v63  ;;  %v5033_v51 = vpop.eup %4406 }
 0x1c4   : > { %v5037_v53 = vpop.eup %4408  ;;  %2148 = vadd.xlane.f32.xlu1 %v2147_v26  ;;  %v2144_v11 = vsel %vm1873_vm2, %v5033_v51, 0.0 }
 0x1c5   : > { %v2138_v5 = vsel %vm1873_vm2, %v5037_v53, 0.0 }
 0x1c6   : > { %2139 = vadd.xlane.f32.xlu0 %v2138_v5 }
 0x1c8   : > { %v5041_v14 = vpop.eup %4410  ;;  %2145 = vadd.xlane.f32.xlu1 %v2144_v11 }
 0x1c9   : > { %v5045_v18 = vpop.eup %4412  ;;  %v2150_v16 = vsel %vm1873_vm2, %v5041_v14, 0.0 }
 0x1ca   : > { %2151 = vadd.xlane.f32.xlu0 %v2150_v16  ;;  %v2156_v52 = vsel %vm1873_vm2, %v5045_v18, 0.0 }
 0x1cc   : > { %v5049_v55 = vpop.eup %4414  ;;  %2157 = vadd.xlane.f32.xlu1 %v2156_v52 }
 0x1cd   : > { %v5053_v8 = vpop.eup %4416  ;;  %v2153_v21 = vsel %vm1873_vm2, %v5049_v55, 0.0 }
 0x1ce   : > { %2154 = vadd.xlane.f32.xlu0 %v2153_v21  ;;  %v2159_v27 = vsel %vm1873_vm2, %v5053_v8, 0.0  ;;  %v366_v21 = vld [vmem:[%s4959_s9 + $0x70] sm:$0xff] }
 0x1d0   : > { %2160 = vadd.xlane.f32.xlu1 %v2159_v27  ;;  %v367_v27 = vld [vmem:[%s4959_s9 + $0x78] sm:$0xff] }
 0x21d   : > { %v2071_v29 = vpop.xlane.xlu0 %2070 }
 0x21e   : > { %4418 = vrcp.f32 %v2071_v29 }
 0x221   : > { %v2077_v32 = vpop.xlane.xlu1 %2076  ;;  %v2068_v13 = vpop.xlane.xlu0 %2067 }
 0x222   : > { %4420 = vrcp.f32 %v2068_v13 }
 0x223   : > { %4422 = vrcp.f32 %v2077_v32 }
 0x225   : > { %v2074_v37 = vpop.xlane.xlu1 %2073 }
 0x226   : > { %4424 = vrcp.f32 %v2074_v37 }
 0x227   : > { %v2083_v39 = vpop.xlane.xlu0 %2082 }
 0x228   : > { %4426 = vrcp.f32 %v2083_v39  ;;  %v4419_v44 = vpop.eup %4418 }
 0x229   : > { %v2089_v40 = vpop.xlane.xlu1 %2088  ;;  %v2165_v22 = vmul.f32 %v4419_v44, %v4887_v4 }
 0x22b   : > { %v2080_v58 = vpop.xlane.xlu0 %2079 }
 0x22c   : > { %4428 = vrcp.f32 %v2080_v58  ;;  %v4421_v36 = vpop.eup %4420  ;;  %v368_v58 = vld [vmem:[%s4959_s9 + $0x80] sm:$0xff] }
 0x22d   : > { %4430 = vrcp.f32 %v2089_v40  ;;  %v2086_v47 = vpop.xlane.xlu1 %2085  ;;  %v2163_v49 = vmul.f32 %v4421_v36, %v4891_v9  ;;  %v4423_v57 = vpop.eup %4422  ;;  %v4302_v9 = vpack.c.bf16 %v363_v23, %v362_v59  ;;  %v4310_v40 = vpack.c.bf16 %v367_v27, %v366_v21  ;;  %v376_v27 = vld [vmem:[%s4959_s9 + $0xc0] sm:$0xff] }
 0x22e   : > { %4432 = vrcp.f32 %v2086_v47  ;;  %v2169_v24 = vmul.f32 %v4423_v57, %v4895_v17  ;;  %v365_v17 = vld [vmem:[%s4959_s9 + $0x68] sm:$0xff]  ;;  %v370_v47 = vld [vmem:[%s4959_s9 + $0x90] sm:$0xff] }
 0x22f   : > { %v2095_v48 = vpop.xlane.xlu0 %2094  ;;  %4078 = vmatprep.mubr.msk.f32.mxu0 %vm1873_vm2, %v2163_v49  ;;  %v371_v49 = vld [vmem:[%s4959_s9 + $0x98] sm:$0xff] }
 0x230   : > { %v4425_v2 = vpop.eup %4424  ;;  %4079 = vmatmul.mubr.msk.f32.vlgmr.msra.gmra.mrb[16].mxu0 %vm1873_vm2, %v2165_v22  ;;  %4434 = vrcp.f32 %v2095_v48 }
 0x231   : > { %v2101_v60 = vpop.xlane.xlu1 %2100  ;;  %v2167_v63 = vmul.f32 %v4425_v2, %v4901_v25  ;;  %4293 = vmatpush3.bf16.msra.mxu0 %v4993_v19  ;;  %v364_v25 = vld [vmem:[%s4959_s9 + $0x60] sm:$0xff]  ;;  %v4318_v2 = vpack.c.bf16 %v371_v49, %v370_v47 }
 0x232   : > { %4299 = vmatprep.subr.bf16.mxu0 %v4298_v50  ;;  %v4427_v26 = vpop.eup %4426  ;;  %v4306_v13 = vpack.c.bf16 %v365_v17, %v364_v25 }
 0x233   : > { %v2092_v4 = vpop.xlane.xlu0 %2091  ;;  %4085 = vmatprep.mubr.msk.f32.mxu1 %vm1873_vm2, %v2167_v63  ;;  %v2173_v32 = vmul.f32 %v4427_v26, %v4909_v41  ;;  %v374_v26 = vld [vmem:[%s4959_s9 + $0xb0] sm:$0xff] }
 0x234   : > { %4436 = vrcp.f32 %v2092_v4  ;;  %4086 = vmatmul.mubr.msk.f32.vlgmr.msra.gmra.mrb[16].mxu1 %vm1873_vm2, %v2169_v24 }
 0x235   : > { %4438 = vrcp.f32 %v2101_v60  ;;  %v2098_v5 = vpop.xlane.xlu1 %2097  ;;  %4297 = vmatpush3.bf16.msra.mxu1 %v5006_v42  ;;  %v372_v60 = vld [vmem:[%s4959_s9 + $0xa0] sm:$0xff] }
 0x236   : > { %v4429_v11 = vpop.eup %4428  ;;  %4440 = vrcp.f32 %v2098_v5  ;;  %4303 = vmatprep.subr.bf16.mxu1 %v4302_v9  ;;  %v375_v5 = vld [vmem:[%s4959_s9 + $0xb8] sm:$0xff] }
 0x237   : > { %v4431_v19 = vpop.eup %4430  ;;  %v2107_v16 = vpop.xlane.xlu0 %2106  ;;  %v2171_v52 = vmul.f32 %v4429_v11, %v4919_v0  ;;  %v4326_v21 = vpack.c.bf16 %v375_v5, %v374_v26 }
 0x238   : > { %v4433_v29 = vpop.eup %4432  ;;  %v2177_v39 = vmul.f32 %v4431_v19, %v4905_v33  ;;  %4442 = vrcp.f32 %v2107_v16  ;;  %v369_v33 = vld [vmem:[%s4959_s9 + $0x88] sm:$0xff] }
 0x239   : > { %4092 = vmatprep.mubr.msk.f32.mxu0 %vm1873_vm2, %v2171_v52  ;;  %v2113_v37 = vpop.xlane.xlu1 %2112  ;;  %v2175_v42 = vmul.f32 %v4433_v29, %v4915_v45  ;;  %v4314_v48 = vpack.c.bf16 %v369_v33, %v368_v58 }
 0x23a   : > { %4093 = vmatmul.mubr.msk.f32.vlgmr.msra.gmra.mrb[18].mxu0 %vm1873_vm2, %v2173_v32  ;;  %v4435_v41 = vpop.eup %4434 }
 0x23b   : > { %v2104_v0 = vpop.xlane.xlu0 %2103  ;;  %4099 = vmatprep.mubr.msk.f32.mxu1 %vm1873_vm2, %v2175_v42  ;;  %4301 = vmatpush3.bf16.msra.mxu0 %v4298_v50  ;;  %v2181_v22 = vmul.f32 %v4435_v41, %v4929_v3  ;;  %v378_v42 = vld [vmem:[%s4959_s9 + $0xd0] sm:$0xff] }
 0x23c   : > { %4444 = vrcp.f32 %v2104_v0  ;;  %4100 = vmatmul.mubr.msk.f32.vlgmr.msra.gmra.mrb[18].mxu1 %vm1873_vm2, %v2177_v39  ;;  %4307 = vmatprep.subr.bf16.mxu0 %v4306_v13  ;;  %v379_v39 = vld [vmem:[%s4959_s9 + $0xd8] sm:$0xff] }
 0x23d   : > { %4446 = vrcp.f32 %v2113_v37  ;;  %v2110_v45 = vpop.xlane.xlu1 %2109  ;;  %4305 = vmatpush3.bf16.msra.mxu1 %v4302_v9 }
 0x23e   : > { %v4437_v44 = vpop.eup %4436  ;;  %4448 = vrcp.f32 %v2110_v45  ;;  %4311 = vmatprep.subr.bf16.mxu1 %v4310_v40 }
 0x23f   : > { %v4439_v31 = vpop.eup %4438  ;;  %v2119_v28 = vpop.xlane.xlu0 %2118  ;;  %v2179_v36 = vmul.f32 %v4437_v44, %v4939_v15  ;;  %v4334_v44 = vpack.c.bf16 %v379_v39, %v378_v42 }
 0x240   : > { %v4441_v57 = vpop.eup %4440  ;;  %v2185_v23 = vmul.f32 %v4439_v31, %v4925_v62  ;;  %4450 = vrcp.f32 %v2119_v28  ;;  %v373_v62 = vld [vmem:[%s4959_s9 + $0xa8] sm:$0xff]  ;;  %v380_v31 = vld [vmem:[%s4959_s9 + $0xe0] sm:$0xff] }
 0x241   : > { %4106 = vmatprep.mubr.msk.f32.mxu0 %vm1873_vm2, %v2179_v36  ;;  %v2125_v50 = vpop.xlane.xlu1 %2124  ;;  %v2183_v59 = vmul.f32 %v4441_v57, %v4935_v7  ;;  %v4322_v11 = vpack.c.bf16 %v373_v62, %v372_v60  ;;  %v382_v57 = vld [vmem:[%s4959_s9 + $0xf0] sm:$0xff] }
 0x242   : > { %4107 = vmatmul.mubr.msk.f32.vlgmr.msra.gmra.mrb[20].mxu0 %vm1873_vm2, %v2181_v22  ;;  %v4443_v3 = vpop.eup %4442  ;;  %v383_v22 = vld [vmem:[%s4959_s9 + $0xf8] sm:$0xff] }
 0x243   : > { %v2116_v15 = vpop.xlane.xlu0 %2115  ;;  %4113 = vmatprep.mubr.msk.f32.mxu1 %vm1873_vm2, %v2183_v59  ;;  %4309 = vmatpush3.bf16.msra.mxu0 %v4306_v13  ;;  %v2189_v17 = vmul.f32 %v4443_v3, %v4949_v30  ;;  %v4342_v3 = vpack.c.bf16 %v383_v22, %v382_v57 }
 0x244   : > { %4452 = vrcp.f32 %v2116_v15  ;;  %4114 = vmatmul.mubr.msk.f32.vlgmr.msra.gmra.mrb[20].mxu1 %vm1873_vm2, %v2185_v23  ;;  %4315 = vmatprep.subr.bf16.mxu0 %v4314_v48 }
 0x245   : > { %4454 = vrcp.f32 %v2125_v50  ;;  %v2122_v7 = vpop.xlane.xlu1 %2121  ;;  %4313 = vmatpush3.bf16.msra.mxu1 %v4310_v40 }
 0x246   : > { %v4445_v63 = vpop.eup %4444  ;;  %4456 = vrcp.f32 %v2122_v7  ;;  %4319 = vmatprep.subr.bf16.mxu1 %v4318_v2 }
 0x247   : > { %v4447_v24 = vpop.eup %4446  ;;  %v2131_v9 = vpop.xlane.xlu0 %2130  ;;  %v2187_v4 = vmul.f32 %v4445_v63, %v4967_v34 }
 0x248   : > { %v4449_v25 = vpop.eup %4448  ;;  %v2193_v52 = vmul.f32 %v4447_v24, %v4945_v20  ;;  %4458 = vrcp.f32 %v2131_v9  ;;  %v377_v20 = vld [vmem:[%s4959_s9 + $0xc8] sm:$0xff] }
 0x249   : > { %4120 = vmatprep.mubr.msk.f32.mxu0 %vm1873_vm2, %v2187_v4  ;;  %v2137_v19 = vpop.xlane.xlu1 %2136  ;;  %v2191_v16 = vmul.f32 %v4449_v25, %v4963_v43  ;;  %v4330_v41 = vpack.c.bf16 %v377_v20, %v376_v27 }
 0x24a   : > { %4121 = vmatmul.mubr.msk.f32.vlgmr.msra.gmra.mrb[22].mxu0 %vm1873_vm2, %v2189_v17  ;;  %v4451_v30 = vpop.eup %4450 }
 0x24b   : > { %v2128_v34 = vpop.xlane.xlu0 %2127  ;;  %4127 = vmatprep.mubr.msk.f32.mxu1 %vm1873_vm2, %v2191_v16  ;;  %4317 = vmatpush3.bf16.msra.mxu0 %v4314_v48  ;;  %v2197_v0 = vmul.f32 %v4451_v30, %v4979_v38 }
 0x24c   : > { %4460 = vrcp.f32 %v2128_v34  ;;  %4128 = vmatmul.mubr.msk.f32.vlgmr.msra.gmra.mrb[22].mxu1 %vm1873_vm2, %v2193_v52  ;;  %4323 = vmatprep.subr.bf16.mxu0 %v4322_v11 }
 0x24d   : > { %4462 = vrcp.f32 %v2137_v19  ;;  %v2134_v43 = vpop.xlane.xlu1 %2133  ;;  %4321 = vmatpush3.bf16.msra.mxu1 %v4318_v2 }
 0x24e   : > { %v4453_v29 = vpop.eup %4452  ;;  %4464 = vrcp.f32 %v2134_v43  ;;  %4327 = vmatprep.subr.bf16.mxu1 %v4326_v21 }
 0x24f   : > { %v4455_v32 = vpop.eup %4454  ;;  %v2143_v13 = vpop.xlane.xlu0 %2142  ;;  %v2195_v37 = vmul.f32 %v4453_v29, %v4991_v6 }
 0x250   : > { %v4457_v40 = vpop.eup %4456  ;;  %v2201_v33 = vmul.f32 %v4455_v32, %v4975_v56  ;;  %4466 = vrcp.f32 %v2143_v13  ;;  %v381_v56 = vld [vmem:[%s4959_s9 + $0xe8] sm:$0xff] }
 0x251   : > { %4134 = vmatprep.mubr.msk.f32.mxu0 %vm1873_vm2, %v2195_v37  ;;  %v2149_v45 = vpop.xlane.xlu1 %2148  ;;  %v2199_v58 = vmul.f32 %v4457_v40, %v4987_v12  ;;  %v4338_v59 = vpack.c.bf16 %v381_v56, %v380_v31 }
 0x252   : > { %4135 = vmatmul.mubr.msk.f32.vlgmr.msra.gmra.mrb[24].mxu0 %vm1873_vm2, %v2197_v0  ;;  %v4459_v38 = vpop.eup %4458 }
 0x253   : > { %v2140_v6 = vpop.xlane.xlu0 %2139  ;;  %4141 = vmatprep.mubr.msk.f32.mxu1 %vm1873_vm2, %v2199_v58  ;;  %4325 = vmatpush3.bf16.msra.mxu0 %v4322_v11  ;;  %v2205_v50 = vmul.f32 %v4459_v38, %v5008_v61 }
 0x254   : > { %4468 = vrcp.f32 %v2140_v6  ;;  %4142 = vmatmul.mubr.msk.f32.vlgmr.msra.gmra.mrb[24].mxu1 %vm1873_vm2, %v2201_v33  ;;  %4331 = vmatprep.subr.bf16.mxu0 %v4330_v41 }
 0x255   : > { %4470 = vrcp.f32 %v2149_v45  ;;  %v2146_v12 = vpop.xlane.xlu1 %2145  ;;  %4329 = vmatpush3.bf16.msra.mxu1 %v4326_v21 }
 0x256   : > { %v4461_v28 = vpop.eup %4460  ;;  %4472 = vrcp.f32 %v2146_v12  ;;  %4335 = vmatprep.subr.bf16.mxu1 %v4334_v44 }
 0x257   : > { %v4463_v36 = vpop.eup %4462  ;;  %v2152_v47 = vpop.xlane.xlu0 %2151  ;;  %v2203_v49 = vmul.f32 %v4461_v28, %v5019_v54 }
 0x258   : > { %v4465_v48 = vpop.eup %4464  ;;  %4474 = vrcp.f32 %v2152_v47  ;;  %v2209_v15 = vmul.f32 %v4463_v36, %v5002_v10 }
 0x259   : > { %4148 = vmatprep.mubr.msk.f32.mxu0 %vm1873_vm2, %v2203_v49  ;;  %v2158_v23 = vpop.xlane.xlu1 %2157  ;;  %v2207_v2 = vmul.f32 %v4465_v48, %v5015_v46 }
 0x25a   : > { %4476 = vrcp.f32 %v2158_v23  ;;  %4149 = vmatmul.mubr.msk.f32.vlgmr.msra.gmra.mrb[26].mxu0 %vm1873_vm2, %v2205_v50  ;;  %v4467_v61 = vpop.eup %4466 }
 0x25b   : > { %v2155_v7 = vpop.xlane.xlu0 %2154  ;;  %4155 = vmatprep.mubr.msk.f32.mxu1 %vm1873_vm2, %v2207_v2  ;;  %4333 = vmatpush3.bf16.msra.mxu0 %v4330_v41  ;;  %v2213_v63 = vmul.f32 %v4467_v61, %v5029_v35 }
 0x25c   : > { %4478 = vrcp.f32 %v2155_v7  ;;  %4156 = vmatmul.mubr.msk.f32.vlgmr.msra.gmra.mrb[26].mxu1 %vm1873_vm2, %v2209_v15  ;;  %4339 = vmatprep.subr.bf16.mxu0 %v4338_v59 }
 0x25d   : > { %v2161_v54 = vpop.xlane.xlu1 %2160  ;;  %4337 = vmatpush3.bf16.msra.mxu1 %v4334_v44 }
 0x25e   : > { %v4469_v60 = vpop.eup %4468  ;;  %4480 = vrcp.f32 %v2161_v54  ;;  %4343 = vmatprep.subr.bf16.mxu1 %v4342_v3 }
 0x25f   : > { %v4471_v46 = vpop.eup %4470  ;;  %v2211_v10 = vmul.f32 %v4469_v60, %v5037_v53 }
 0x260   : > { %v4473_v62 = vpop.eup %4472  ;;  %v2217_v4 = vmul.f32 %v4471_v46, %v5025_v1 }
 0x261   : > { %4162 = vmatprep.mubr.msk.f32.mxu0 %vm1873_vm2, %v2211_v10  ;;  %v2215_v24 = vmul.f32 %v4473_v62, %v5033_v51 }
 0x262   : > { %v4475_v9 = vpop.eup %4474  ;;  %4163 = vmatmul.mubr.msk.f32.vlgmr.msra.gmra.mrb[28].mxu0 %vm1873_vm2, %v2213_v63 }
 0x263   : > { %4169 = vmatprep.mubr.msk.f32.mxu1 %vm1873_vm2, %v2215_v24  ;;  %v2219_v26 = vmul.f32 %v4475_v9, %v5041_v14  ;;  %4341 = vmatpush3.bf16.msra.mxu0 %v4338_v59 }
 0x264   : > { %v4477_v5 = vpop.eup %4476  ;;  %4170 = vmatmul.mubr.msk.f32.vlgmr.msra.gmra.mrb[28].mxu1 %vm1873_vm2, %v2217_v4 }
 0x265   : > { %4176 = vmatprep.mubr.msk.f32.mxu0 %vm1873_vm2, %v2219_v26  ;;  %4345 = vmatpush3.bf16.msra.mxu1 %v4342_v3  ;;  %v2223_v35 = vmul.f32 %v4477_v5, %v5045_v18 }
 0x266   : > { %v4479_v51 = vpop.eup %4478 }
 0x267   : > { %v2221_v53 = vmul.f32 %v4479_v51, %v5049_v55  ;;  %4183 = vmatprep.mubr.msk.f32.mxu1 %vm1873_vm2, %v2223_v35 }
 0x268   : > { %v4481_v1 = vpop.eup %4480 }
 0x269   : > { %v2225_v25 = vmul.f32 %v4481_v1, %v5053_v8  ;;  %4177 = vmatmul.mubr.msk.f32.vlgmr.msra.gmra.mrb[30].mxu0 %vm1873_vm2, %v2221_v53 }
 0x26b   : > { %4184 = vmatmul.mubr.msk.f32.vlgmr.msra.gmra.mrb[30].mxu1 %vm1873_vm2, %v2225_v25 }
 0x303   : > { %v4080_v14 = vpop.f32.mrb[16].mxu0 }
 0x304   : > { %3523 = vst.msk [vmem:[%s5153_s12 + $0x8] sm:$0xff] %vm384_vm0, %v4080_v14  ;;  %v2298_v18 = vpop.f32.mrb[17].mxu0 }
 0x305   : > { %3522 = vst.msk [vmem:[%s5153_s12] sm:$0xff] %vm384_vm0, %v2298_v18 }
 0x307   : > { %v4087_v55 = vpop.f32.mrb[16].mxu1 }
 0x308   : > { %3525 = vst.msk [vmem:[%s5153_s12 + $0x18] sm:$0xff] %vm384_vm0, %v4087_v55  ;;  %v2379_v8 = vpop.f32.mrb[17].mxu1 }
 0x309   : > { %3524 = vst.msk [vmem:[%s5153_s12 + $0x10] sm:$0xff] %vm384_vm0, %v2379_v8 }
 0x30d   : > { %v4094_v17 = vpop.f32.mrb[18].mxu0 }
 0x30e   : > { %3527 = vst.msk [vmem:[%s5153_s12 + $0x28] sm:$0xff] %vm384_vm0, %v4094_v17  ;;  %v2460_v11 = vpop.f32.mrb[19].mxu0 }
 0x30f   : > { %3526 = vst.msk [vmem:[%s5153_s12 + $0x20] sm:$0xff] %vm384_vm0, %v2460_v11  ;;  %v4101_v19 = vpop.f32.mrb[18].mxu1 }
 0x310   : > { %3529 = vst.msk [vmem:[%s5153_s12 + $0x38] sm:$0xff] %vm384_vm0, %v4101_v19  ;;  %v2541_v16 = vpop.f32.mrb[19].mxu1 }
 0x311   : > { %3528 = vst.msk [vmem:[%s5153_s12 + $0x30] sm:$0xff] %vm384_vm0, %v2541_v16 }
 0x315   : > { %v4108_v52 = vpop.f32.mrb[20].mxu0 }
 0x316   : > { %3531 = vst.msk [vmem:[%s5153_s12 + $0x48] sm:$0xff] %vm384_vm0, %v4108_v52  ;;  %v2622_v21 = vpop.f32.mrb[21].mxu0 }
 0x317   : > { %3530 = vst.msk [vmem:[%s5153_s12 + $0x40] sm:$0xff] %vm384_vm0, %v2622_v21  ;;  %v4115_v34 = vpop.f32.mrb[20].mxu1 }
 0x318   : > { %3533 = vst.msk [vmem:[%s5153_s12 + $0x58] sm:$0xff] %vm384_vm0, %v4115_v34  ;;  %v2703_v30 = vpop.f32.mrb[21].mxu1 }
 0x319   : > { %3532 = vst.msk [vmem:[%s5153_s12 + $0x50] sm:$0xff] %vm384_vm0, %v2703_v30 }
 0x31d   : > { %v4122_v43 = vpop.f32.mrb[22].mxu0 }
 0x31e   : > { %3535 = vst.msk [vmem:[%s5153_s12 + $0x68] sm:$0xff] %vm384_vm0, %v4122_v43  ;;  %v2784_v27 = vpop.f32.mrb[23].mxu0 }
 0x31f   : > { %3534 = vst.msk [vmem:[%s5153_s12 + $0x60] sm:$0xff] %vm384_vm0, %v2784_v27  ;;  %v4129_v20 = vpop.f32.mrb[22].mxu1 }
 0x320   : > { %3537 = vst.msk [vmem:[%s5153_s12 + $0x78] sm:$0xff] %vm384_vm0, %v4129_v20  ;;  %v2865_v29 = vpop.f32.mrb[23].mxu1 }
 0x321   : > { %3536 = vst.msk [vmem:[%s5153_s12 + $0x70] sm:$0xff] %vm384_vm0, %v2865_v29 }
 0x325   : > { %v4136_v32 = vpop.f32.mrb[24].mxu0 }
 0x326   : > { %3539 = vst.msk [vmem:[%s5153_s12 + $0x88] sm:$0xff] %vm384_vm0, %v4136_v32  ;;  %v2946_v13 = vpop.f32.mrb[25].mxu0 }
 0x327   : > { %3538 = vst.msk [vmem:[%s5153_s12 + $0x80] sm:$0xff] %vm384_vm0, %v2946_v13  ;;  %v4143_v37 = vpop.f32.mrb[24].mxu1 }
 0x328   : > { %3541 = vst.msk [vmem:[%s5153_s12 + $0x98] sm:$0xff] %vm384_vm0, %v4143_v37  ;;  %v3027_v42 = vpop.f32.mrb[25].mxu1 }
 0x329   : > { %3540 = vst.msk [vmem:[%s5153_s12 + $0x90] sm:$0xff] %vm384_vm0, %v3027_v42 }
 0x32d   : > { %v4150_v39 = vpop.f32.mrb[26].mxu0 }
 0x32e   : > { %3543 = vst.msk [vmem:[%s5153_s12 + $0xa8] sm:$0xff] %vm384_vm0, %v4150_v39  ;;  %v3108_v40 = vpop.f32.mrb[27].mxu0 }
 0x32f   : > { %3542 = vst.msk [vmem:[%s5153_s12 + $0xa0] sm:$0xff] %vm384_vm0, %v3108_v40  ;;  %v4157_v0 = vpop.f32.mrb[26].mxu1 }
 0x330   : > { %3545 = vst.msk [vmem:[%s5153_s12 + $0xb8] sm:$0xff] %vm384_vm0, %v4157_v0  ;;  %v3189_v41 = vpop.f32.mrb[27].mxu1 }
 0x331   : > { %3544 = vst.msk [vmem:[%s5153_s12 + $0xb0] sm:$0xff] %vm384_vm0, %v3189_v41 }
 0x335   : > { %v4164_v45 = vpop.f32.mrb[28].mxu0 }
 0x336   : > { %3547 = vst.msk [vmem:[%s5153_s12 + $0xc8] sm:$0xff] %vm384_vm0, %v4164_v45  ;;  %v3270_v58 = vpop.f32.mrb[29].mxu0 }
 0x337   : > { %3546 = vst.msk [vmem:[%s5153_s12 + $0xc0] sm:$0xff] %vm384_vm0, %v3270_v58  ;;  %v4171_v33 = vpop.f32.mrb[28].mxu1 }
 0x338   : > { %3549 = vst.msk [vmem:[%s5153_s12 + $0xd8] sm:$0xff] %vm384_vm0, %v4171_v33  ;;  %v3351_v44 = vpop.f32.mrb[29].mxu1 }
 0x339   : > { %3548 = vst.msk [vmem:[%s5153_s12 + $0xd0] sm:$0xff] %vm384_vm0, %v3351_v44 }
 0x33c   : > { %v4178_v6 = vpop.f32.mrb[30].mxu0 }
 0x33d   : > { %3551 = vst.msk [vmem:[%s5153_s12 + $0xe8] sm:$0xff] %vm384_vm0, %v4178_v6  ;;  %v3432_v38 = vpop.f32.mrb[31].mxu0 }
 0x33e   : > { %3550 = vst.msk [vmem:[%s5153_s12 + $0xe0] sm:$0xff] %vm384_vm0, %v3432_v38  ;;  %v4185_v12 = vpop.f32.mrb[30].mxu1 }
 0x33f   : > { %3553 = vst.msk [vmem:[%s5153_s12 + $0xf8] sm:$0xff] %vm384_vm0, %v4185_v12  ;;  %v3513_v31 = vpop.f32.mrb[31].mxu1 }
 0x340   : > { %3552 = vst.msk [vmem:[%s5153_s12 + $0xf0] sm:$0xff] %vm384_vm0, %v3513_v31 }
 0x341 PF: > { %s14_s15 = sadd.s32 1, %s4488_s15  }
 0x342   : > { %p11_p4 = scmp.ge.s32.totalorder %s14_s15, 4  }
 0x344   :  { %13 = sbr.rel (!%p11_p4) target bundleno = 1 (0x1), region = 72 }

</bundles_post_ra>
